<compile_context>
chip_gen: v5e
topology: v5e:2x2
jax: 0.10.0
libtpu: 0.0.40
codegen_flags: <defaults>
</compile_context>

<pallas_src>
import numpy as np
import jax
import jax.numpy as jnp
from jax.experimental import pallas as pl
from jax.experimental.pallas import tpu as pltpu

BN_EPS = 1e-5


# ------------------- host-side operator packing (one-time) -------------------

def _pool_select_matrices(h, w):
    """4 selection matrices (h*w, h//2*w//2); max_k(x_flat @ P[k]) == 2x2 maxpool."""
    ho, wo = h // 2, w // 2
    P = np.zeros((4, h * w, ho * wo), np.float32)
    for k, (dh, dw) in enumerate(((0, 0), (0, 1), (1, 0), (1, 1))):
        for yo in range(ho):
            for xo in range(wo):
                P[k, (2 * yo + dh) * w + (2 * xo + dw), yo * wo + xo] = 1.0
    return P


def _conv_same_matrices(kernel, h, w):
    """kernel: (Cin, K, K) -> (Cin, h*w, h*w) with out_flat = sum_c in_flat[c] @ M[c]
    (stride 1, 'same' zero padding, cross-correlation like nn.Conv2d)."""
    cin, K, _ = kernel.shape
    pad = K // 2
    M = np.zeros((cin, h * w, h * w), np.float32)
    for c in range(cin):
        for yo in range(h):
            for xo in range(w):
                for kh in range(K):
                    yi = yo + kh - pad
                    if not 0 <= yi < h:
                        continue
                    for kw in range(K):
                        xi = xo + kw - pad
                        if 0 <= xi < w:
                            M[c, yi * w + xi, yo * w + xo] = kernel[c, kh, kw]
    return M


def _up_vec_matrix(n_in, n_out):
    """1-D weights of F.interpolate(scale_factor=2, mode='bilinear', align_corners=True)."""
    if n_in == 1:
        return np.ones((n_out, 1), np.float32)
    M = np.zeros((n_out, n_in), np.float32)
    for o in range(n_out):
        src = o * (n_in - 1) / (n_out - 1)
        i0 = min(int(np.floor(src)), n_in - 2)
        frac = src - i0
        M[o, i0] += 1.0 - frac
        M[o, i0 + 1] += frac
    return M


def _upsample2_matrix(h, w):
    """(h*w, 2h*2w) so that up_flat = x_flat @ U (bilinear, align_corners=True)."""
    U = np.kron(_up_vec_matrix(h, 2 * h), _up_vec_matrix(w, 2 * w)).T
    return np.ascontiguousarray(U).astype(np.float32)


# ------------------------------- Pallas kernel -------------------------------

def _pyramid_attention_kernel(x_ref, pool1_ref, pool2_ref, pool3_ref,
                              wd1_ref, wd2_ref, wd3_ref,
                              wc3_ref, wc2_ref, wc1_ref,
                              u2_ref, u4_ref, u8_ref,
                              wmid_ref, bmid_ref, bias_ref,
                              o_ref, pcat_ref):
    """One batch chunk (Bt rows in the matmul M dim) per grid step.

    x_ref    : (Bt, Cin*S)   bf16, NCHW chunk flattened channel-major (lane-dense)
    pool*    : (S_in, 4*S_out) bf16  fused maxpool selection (4 offsets along lanes)
    wd1_ref  : (Cin*S1, S1)  bf16    down1 conv operator, input channels stacked on K
    wd2..wc1 : (S_lvl, S_lvl) bf16   'same' conv operator matrices (BN folded)
    u2/u4/u8 : bilinear x2 upsample operator matrices, bf16
    wmid     : (Cout*Cin,) f32 SMEM  mid 1x1 conv weights (BN folded)
    bmid     : (Cout,)     f32 SMEM  mid bias
    bias     : (6,)        f32 SMEM  [d1, d2, d3, c3, c2, c1] biases (BN folded)
    o_ref    : (Bt, Cout*S) f32
    pcat_ref : (Bt, Cin*S1) f32 VMEM scratch (lane assembly of pooled channels)
    """
    S = pool1_ref.shape[0]
    S1 = wc1_ref.shape[0]
    S2 = wc2_ref.shape[0]
    S3 = wc3_ref.shape[0]
    Cin = x_ref.shape[1] // S
    Cout = o_ref.shape[1] // S

    def dotf(a, b_ref):
        # MXU matmul: bf16 operands, f32 accumulation.
        return jnp.dot(a.astype(jnp.bfloat16), b_ref[...],
                       preferred_element_type=jnp.float32)

    def max4(q, n):
        # q = (Bt, 4*n) with the four 2x2-pool offsets stacked along lanes.
        return jnp.maximum(jnp.maximum(q[:, 0:n], q[:, n:2 * n]),
                           jnp.maximum(q[:, 2 * n:3 * n], q[:, 3 * n:4 * n]))

    x = x_ref[...]                                         # (Bt, Cin*S) bf16
    xc = [x[:, c * S:(c + 1) * S] for c in range(Cin)]     # 128-aligned lane views

    # ---- down1: one fused maxpool matmul per channel, then ONE conv matmul with
    # K = Cin*S1 (channels assembled along lanes in a small VMEM scratch).
    for c in range(Cin):
        pcat_ref[:, c * S1:(c + 1) * S1] = max4(dotf(xc[c], pool1_ref), S1)
    x1 = jnp.maximum(dotf(pcat_ref[...], wd1_ref) + bias_ref[0], 0.0)    # (Bt, S1)

    # ---- down2 / down3 (single channel, batch rows in M)
    x2 = jnp.maximum(dotf(max4(dotf(x1, pool2_ref), S2), wd2_ref)
                     + bias_ref[1], 0.0)                                 # (Bt, S2)
    x3 = jnp.maximum(dotf(max4(dotf(x2, pool3_ref), S3), wd3_ref)
                     + bias_ref[2], 0.0)                                 # (Bt, S3)

    # ---- up path: conv + add + bilinear upsample
    a = jnp.maximum(dotf(x3, wc3_ref) + bias_ref[3], 0.0)                # (Bt, S3)
    a = dotf(a, u2_ref)                                                  # (Bt, S2)
    a = jnp.maximum(dotf(x2, wc2_ref) + bias_ref[4], 0.0) + a
    a = dotf(a, u4_ref)                                                  # (Bt, S1)
    a = jnp.maximum(dotf(x1, wc1_ref) + bias_ref[5], 0.0) + a
    a = dotf(a, u8_ref)                                                  # (Bt, S)

    # ---- mid 1x1 ConvBnRelu on the VPU (scalar-broadcast FMAs, weights in SMEM),
    # fused with the attention multiply; overlaps the MXU pyramid chain.
    xf = [v.astype(jnp.float32) for v in xc]              # hoisted channel views
    for o in range(Cout):
        m = bmid_ref[o] + wmid_ref[o * Cin] * xf[0]
        for c in range(1, Cin):
            m = m + wmid_ref[o * Cin + c] * xf[c]
        o_ref[:, o * S:(o + 1) * S] = a * jnp.maximum(m, 0.0)


def pyramid_attention_forward(x, K):
    """PyramidAttention.forward with use_pa=True as one fused Pallas kernel."""
    B, Cin, H, W = x.shape
    S = H * W
    S1, S2, S3 = (H // 2) * (W // 2), (H // 4) * (W // 4), (H // 8) * (W // 8)
    Cout = K['bmid'].shape[0]

    # Batch rows go into the matmul M dimension (biggest MXU-utilization lever);
    # for large B, grid = B // Bt >= 2 chunks so megacore can still split.
    Bt = min(B, 128)
    assert B % Bt == 0, "pad the batch to a multiple of the batch tile"
    grid = (B // Bt,)
    const = lambda b: (0, 0)

    # Explicit VMEM budget (v7x has 64 MiB physical / 32 MiB default scoped limit).
    op_bytes = sum(int(np.prod(v.shape)) * v.dtype.itemsize for v in K.values())
    io_bytes = Bt * Cin * S * 2 + Bt * Cout * S * 4
    vmem_limit = int(min(96 << 20, 2 * (op_bytes + io_bytes) + (16 << 20)))

    out = pl.pallas_call(
        _pyramid_attention_kernel,
        out_shape=jax.ShapeDtypeStruct((B, Cout * S), jnp.float32),
        grid=grid,
        in_specs=[
            pl.BlockSpec((Bt, Cin * S), lambda b: (b, 0)),       # x (bf16, lane-dense)
            pl.BlockSpec((S, 4 * S1), const),                    # fused pool1 selection
            pl.BlockSpec((S1, 4 * S2), const),                   # fused pool2 selection
            pl.BlockSpec((S2, 4 * S3), const),                   # fused pool3 selection
            pl.BlockSpec((Cin * S1, S1), const),                 # d1 conv op (channels on K)
            pl.BlockSpec((S2, S2), const),                       # d2 conv op (5x5)
            pl.BlockSpec((S3, S3), const),                       # d3 conv op (3x3)
            pl.BlockSpec((S3, S3), const),                       # c3 conv op (3x3)
            pl.BlockSpec((S2, S2), const),                       # c2 conv op (5x5)
            pl.BlockSpec((S1, S1), const),                       # c1 conv op (7x7)
            pl.BlockSpec((S3, S2), const),                       # upsample S3->S2
            pl.BlockSpec((S2, S1), const),                       # upsample S2->S1
            pl.BlockSpec((S1, S), const),                        # upsample S1->S
            pl.BlockSpec(memory_space=pltpu.MemorySpace.SMEM),   # wmid (Cout*Cin,)
            pl.BlockSpec(memory_space=pltpu.MemorySpace.SMEM),   # bmid (Cout,)
            pl.BlockSpec(memory_space=pltpu.MemorySpace.SMEM),   # pyramid biases (6,)
        ],
        out_specs=pl.BlockSpec((Bt, Cout * S), lambda b: (b, 0)),
        scratch_shapes=[pltpu.VMEM((Bt, Cin * S1), jnp.float32)],
        compiler_params=pltpu.CompilerParams(
            dimension_semantics=("parallel",),
            vmem_limit_bytes=vmem_limit),
    )(x.reshape(B, Cin * S).astype(jnp.bfloat16),
      K['pool1'], K['pool2'], K['pool3'],
      K['wd1s'], K['wd2'], K['wd3'],
      K['wc3'], K['wc2'], K['wc1'],
      K['u2'], K['u4'], K['u8'],
      K['wmid'], K['bmid'], K['biases'])
    return out.reshape(B, Cout, H, W)


# ----------------------- parameters (deterministic) ---------------------------

def _init_conv(key, o, c, k):
    k1, k2 = jax.random.split(key)
    w = jax.random.normal(k1, (o, c, k, k), jnp.float32) / np.sqrt(c * k * k)
    b = 0.1 * jax.random.normal(k2, (o,), jnp.float32)
    return w, b


def _init_bn(key, c):
    k1, k2, k3, k4 = jax.random.split(key, 4)
    gamma = 1.0 + 0.1 * jax.random.normal(k1, (c,), jnp.float32)
    beta = 0.1 * jax.random.normal(k2, (c,), jnp.float32)
    mean = 0.1 * jax.random.normal(k3, (c,), jnp.float32)
    var = 1.0 + 0.5 * jax.random.uniform(k4, (c,), jnp.float32)
    return gamma, beta, mean, var


def _fold_bn(w, b, bn, eps=BN_EPS):
    # inference-mode BatchNorm folded into the conv
    gamma, beta, mean, var = bn
    scale = gamma / jnp.sqrt(var + eps)
    return w * scale[:, None, None, None], (b - mean) * scale + beta


def init_params(key, in_channels, out_channels):
    keys = jax.random.split(key, 14)
    P = {}
    # mid: 1x1 conv (Cin -> Cout) + BN(Cout) + ReLU
    w, b = _init_conv(keys[0], out_channels, in_channels, 1)
    wf, bf = _fold_bn(w, b, _init_bn(keys[1], out_channels))
    P['mid_w'] = wf[:, :, 0, 0]                  # (Cout, Cin)
    P['mid_b'] = bf                              # (Cout,)
    specs = [('d1', in_channels, 7), ('d2', 1, 5), ('d3', 1, 3),
             ('c3', 1, 3), ('c2', 1, 5), ('c1', 1, 7)]
    for idx, (name, cin, k) in enumerate(specs):
        w, b = _init_conv(keys[2 + 2 * idx], 1, cin, k)
        wf, bf = _fold_bn(w, b, _init_bn(keys[3 + 2 * idx], 1))
        P[name + '_w'] = wf                      # (1, cin, k, k)
        P[name + '_b'] = bf                      # (1,)
    return P


def pack_params(P, H, W):
    """Pre-pack folded conv weights into the bf16 operator matrices used by the
    fused kernel (host-side, one-time weight packing)."""
    assert H % 8 == 0 and W % 8 == 0, "pyramid needs three 2x2 maxpools"
    H2, W2, H4, W4, H8, W8 = H // 2, W // 2, H // 4, W // 4, H // 8, W // 8
    bf16 = jnp.bfloat16

    def fuse_pool(h, w):
        # (h*w, 4*(h//2)*(w//2)): the four 2x2-pool offsets stacked along lanes.
        sel = _pool_select_matrices(h, w)
        return jnp.asarray(np.concatenate(list(sel), axis=1), bf16)

    d1 = _conv_same_matrices(np.asarray(P['d1_w'])[0], H2, W2)   # (Cin, S1, S1)
    cin, s1, _ = d1.shape
    conv = lambda name, h, w: jnp.asarray(
        _conv_same_matrices(np.asarray(P[name])[0], h, w)[0], bf16)

    return {
        'pool1': fuse_pool(H, W),
        'pool2': fuse_pool(H2, W2),
        'pool3': fuse_pool(H4, W4),
        'wd1s': jnp.asarray(d1.reshape(cin * s1, s1), bf16),     # channels stacked on K
        'wd2': conv('d2_w', H4, W4),
        'wd3': conv('d3_w', H8, W8),
        'wc3': conv('c3_w', H8, W8),
        'wc2': conv('c2_w', H4, W4),
        'wc1': conv('c1_w', H2, W2),
        'u2': jnp.asarray(_upsample2_matrix(H8, W8), bf16),
        'u4': jnp.asarray(_upsample2_matrix(H4, W4), bf16),
        'u8': jnp.asarray(_upsample2_matrix(H2, W2), bf16),
        'wmid': P['mid_w'].reshape(-1).astype(jnp.float32),      # (Cout*Cin,) SMEM
        'bmid': P['mid_b'].astype(jnp.float32),                  # (Cout,)     SMEM
        'biases': jnp.stack([P['d1_b'][0], P['d2_b'][0], P['d3_b'][0],
                             P['c3_b'][0], P['c2_b'][0], P['c1_b'][0]]
                            ).astype(jnp.float32),               # (6,)        SMEM
    }


# --------------------------- pure-JAX reference -------------------------------

def maxpool2x2(x):
    B, C, H, W = x.shape
    return jnp.max(x.reshape(B, C, H // 2, 2, W // 2, 2), axis=(3, 5))


def bilinear_up2(x):
    # F.interpolate(scale_factor=2, mode='bilinear', align_corners=True)
    B, C, H, W = x.shape
    Mh = jnp.asarray(_up_vec_matrix(H, 2 * H))
    Mw = jnp.asarray(_up_vec_matrix(W, 2 * W))
    return jnp.einsum('oh,pw,bchw->bcop', Mh, Mw, x)


def _ref_cbr(x, w, b, pad):
    y = jax.lax.conv_general_dilated(
        x, w, window_strides=(1, 1), padding=[(pad, pad), (pad, pad)],
        dimension_numbers=('NCHW', 'OIHW', 'NCHW'),
        precision=jax.lax.Precision.HIGHEST)
    return jnp.maximum(y + b.reshape(1, -1, 1, 1), 0.0)


def reference_forward(x, P):
    x1 = _ref_cbr(maxpool2x2(x), P['d1_w'], P['d1_b'], 3)
    x2 = _ref_cbr(maxpool2x2(x1), P['d2_w'], P['d2_b'], 2)
    x3 = _ref_cbr(maxpool2x2(x2), P['d3_w'], P['d3_b'], 1)
    a = bilinear_up2(_ref_cbr(x3, P['c3_w'], P['c3_b'], 1))
    a = bilinear_up2(_ref_cbr(x2, P['c2_w'], P['c2_b'], 2) + a)
    a = bilinear_up2(_ref_cbr(x1, P['c1_w'], P['c1_b'], 3) + a)
    mid = jnp.einsum('dc,bchw->bdhw', P['mid_w'], x,
                     precision=jax.lax.Precision.HIGHEST)
    mid = jnp.maximum(mid + P['mid_b'].reshape(1, -1, 1, 1), 0.0)
    return a * mid


# ----------------------------------- main --------------------------------------

if __name__ == "__main__":
    B, Cin, Cout, H, W = 2, 4, 8, 16, 16
    key = jax.random.PRNGKey(0)
    kx, kp = jax.random.split(key)
    x = jax.random.normal(kx, (B, Cin, H, W), jnp.float32)
    params = init_params(kp, Cin, Cout)
    packed = pack_params(params, H, W)

    out = jax.jit(pyramid_attention_forward)(x, packed)
    out = jax.block_until_ready(out)
    assert out.shape == (B, Cout, H, W), out.shape

    ref = reference_forward(x, params)
    # bf16 MXU operands (perf review) with f32 accumulation: absolute tolerance
    # sized for bf16 input/weight rounding on O(1)..O(4) outputs.
    np.testing.assert_allclose(np.asarray(out), np.asarray(ref), rtol=5e-2, atol=1e-1)

    print("KERNEL_OK")
</pallas_src>

<mosaic_0001>
module attributes {stable_mosaic.version = 11 : i64} {
  func.func @_pyramid_attention_kernel(%arg0: i32, %arg1: memref<2x1024xbf16, #tpu.memory_space<vmem>>, %arg2: memref<256x256xbf16, #tpu.memory_space<vmem>>, %arg3: memref<64x64xbf16, #tpu.memory_space<vmem>>, %arg4: memref<16x16xbf16, #tpu.memory_space<vmem>>, %arg5: memref<256x64xbf16, #tpu.memory_space<vmem>>, %arg6: memref<16x16xbf16, #tpu.memory_space<vmem>>, %arg7: memref<4x4xbf16, #tpu.memory_space<vmem>>, %arg8: memref<4x4xbf16, #tpu.memory_space<vmem>>, %arg9: memref<16x16xbf16, #tpu.memory_space<vmem>>, %arg10: memref<64x64xbf16, #tpu.memory_space<vmem>>, %arg11: memref<4x16xbf16, #tpu.memory_space<vmem>>, %arg12: memref<16x64xbf16, #tpu.memory_space<vmem>>, %arg13: memref<64x256xbf16, #tpu.memory_space<vmem>>, %arg14: memref<32xf32, #tpu.memory_space<smem>>, %arg15: memref<8xf32, #tpu.memory_space<smem>>, %arg16: memref<6xf32, #tpu.memory_space<smem>>, %arg17: memref<2x2048xf32, #tpu.memory_space<vmem>>, %arg18: memref<2x256xf32, #tpu.memory_space<vmem>>) attributes {dimension_semantics = [#tpu.dimension_semantics<parallel>], iteration_bounds = array<i64: 1>, scalar_prefetch = 0 : i64, scratch_operands = 1 : i64, tpu.core_type = #tpu.core_type<tc>, window_params = [{transform_indices = @transform_0, window_bounds = array<i64: 2, 1024>}, {pipeline_mode = #tpu.pipeline_mode<synchronous>, transform_indices = @transform_1, window_bounds = array<i64: 256, 256>}, {pipeline_mode = #tpu.pipeline_mode<synchronous>, transform_indices = @transform_2, window_bounds = array<i64: 64, 64>}, {pipeline_mode = #tpu.pipeline_mode<synchronous>, transform_indices = @transform_3, window_bounds = array<i64: 16, 16>}, {pipeline_mode = #tpu.pipeline_mode<synchronous>, transform_indices = @transform_4, window_bounds = array<i64: 256, 64>}, {pipeline_mode = #tpu.pipeline_mode<synchronous>, transform_indices = @transform_5, window_bounds = array<i64: 16, 16>}, {pipeline_mode = #tpu.pipeline_mode<synchronous>, transform_indices = @transform_6, window_bounds = array<i64: 4, 4>}, {pipeline_mode = #tpu.pipeline_mode<synchronous>, transform_indices = @transform_7, window_bounds = array<i64: 4, 4>}, {pipeline_mode = #tpu.pipeline_mode<synchronous>, transform_indices = @transform_8, window_bounds = array<i64: 16, 16>}, {pipeline_mode = #tpu.pipeline_mode<synchronous>, transform_indices = @transform_9, window_bounds = array<i64: 64, 64>}, {pipeline_mode = #tpu.pipeline_mode<synchronous>, transform_indices = @transform_10, window_bounds = array<i64: 4, 16>}, {pipeline_mode = #tpu.pipeline_mode<synchronous>, transform_indices = @transform_11, window_bounds = array<i64: 16, 64>}, {pipeline_mode = #tpu.pipeline_mode<synchronous>, transform_indices = @transform_12, window_bounds = array<i64: 64, 256>}, {transform_indices = @transform_13, window_bounds = array<i64: 32>}, {transform_indices = @transform_14, window_bounds = array<i64: 8>}, {transform_indices = @transform_15, window_bounds = array<i64: 6>}, {transform_indices = @transform_16, window_bounds = array<i64: 2, 2048>}]} {
    %c0 = arith.constant 0 : index
    %c0_0 = arith.constant 0 : index
    %0 = vector.load %arg1[%c0, %c0_0] : memref<2x1024xbf16, #tpu.memory_space<vmem>>, vector<2x1024xbf16>
    %1 = vector.extract_strided_slice %0 {offsets = [0, 0], sizes = [2, 256], strides = [1, 1]} : vector<2x1024xbf16> to vector<2x256xbf16>
    %2 = vector.extract_strided_slice %0 {offsets = [0, 256], sizes = [2, 256], strides = [1, 1]} : vector<2x1024xbf16> to vector<2x256xbf16>
    %3 = vector.extract_strided_slice %0 {offsets = [0, 512], sizes = [2, 256], strides = [1, 1]} : vector<2x1024xbf16> to vector<2x256xbf16>
    %4 = vector.extract_strided_slice %0 {offsets = [0, 768], sizes = [2, 256], strides = [1, 1]} : vector<2x1024xbf16> to vector<2x256xbf16>
    %c0_1 = arith.constant 0 : index
    %c0_2 = arith.constant 0 : index
    %5 = vector.load %arg2[%c0_1, %c0_2] : memref<256x256xbf16, #tpu.memory_space<vmem>>, vector<256x256xbf16>
    %cst = arith.constant dense<0.000000e+00> : vector<2x256xf32>
    %6 = tpu.matmul %1, %5, %cst {dimension_numbers = #tpu.dot_dimension_numbers<[1], [0], [0], [1], [0, 0, 1, 1], [], []>} : vector<2x256xbf16>, vector<256x256xbf16>, vector<2x256xf32> -> vector<2x256xf32>
    %7 = vector.extract_strided_slice %6 {offsets = [0, 0], sizes = [2, 64], strides = [1, 1]} : vector<2x256xf32> to vector<2x64xf32>
    %8 = vector.extract_strided_slice %6 {offsets = [0, 64], sizes = [2, 64], strides = [1, 1]} : vector<2x256xf32> to vector<2x64xf32>
    %9 = arith.maximumf %7, %8 : vector<2x64xf32>
    %10 = vector.extract_strided_slice %6 {offsets = [0, 128], sizes = [2, 64], strides = [1, 1]} : vector<2x256xf32> to vector<2x64xf32>
    %11 = vector.extract_strided_slice %6 {offsets = [0, 192], sizes = [2, 64], strides = [1, 1]} : vector<2x256xf32> to vector<2x64xf32>
    %12 = arith.maximumf %10, %11 : vector<2x64xf32>
    %13 = arith.maximumf %9, %12 : vector<2x64xf32>
    %c0_3 = arith.constant 0 : index
    %c0_4 = arith.constant 0 : index
    %14 = vector.load %arg18[%c0_3, %c0_4] : memref<2x256xf32, #tpu.memory_space<vmem>>, vector<2x64xf32>
    tpu.vector_store %arg18[%c0_3, %c0_4], %13 {strides = array<i32>} : memref<2x256xf32, #tpu.memory_space<vmem>>, vector<2x64xf32>,
    %c0_5 = arith.constant 0 : index
    %c0_6 = arith.constant 0 : index
    %15 = vector.load %arg2[%c0_5, %c0_6] : memref<256x256xbf16, #tpu.memory_space<vmem>>, vector<256x256xbf16>
    %cst_7 = arith.constant dense<0.000000e+00> : vector<2x256xf32>
    %16 = tpu.matmul %2, %15, %cst_7 {dimension_numbers = #tpu.dot_dimension_numbers<[1], [0], [0], [1], [0, 0, 1, 1], [], []>} : vector<2x256xbf16>, vector<256x256xbf16>, vector<2x256xf32> -> vector<2x256xf32>
    %17 = vector.extract_strided_slice %16 {offsets = [0, 0], sizes = [2, 64], strides = [1, 1]} : vector<2x256xf32> to vector<2x64xf32>
    %18 = vector.extract_strided_slice %16 {offsets = [0, 64], sizes = [2, 64], strides = [1, 1]} : vector<2x256xf32> to vector<2x64xf32>
    %19 = arith.maximumf %17, %18 : vector<2x64xf32>
    %20 = vector.extract_strided_slice %16 {offsets = [0, 128], sizes = [2, 64], strides = [1, 1]} : vector<2x256xf32> to vector<2x64xf32>
    %21 = vector.extract_strided_slice %16 {offsets = [0, 192], sizes = [2, 64], strides = [1, 1]} : vector<2x256xf32> to vector<2x64xf32>
    %22 = arith.maximumf %20, %21 : vector<2x64xf32>
    %23 = arith.maximumf %19, %22 : vector<2x64xf32>
    %c0_8 = arith.constant 0 : index
    %c64 = arith.constant 64 : index
    %24 = vector.load %arg18[%c0_8, %c64] : memref<2x256xf32, #tpu.memory_space<vmem>>, vector<2x64xf32>
    tpu.vector_store %arg18[%c0_8, %c64], %23 {strides = array<i32>} : memref<2x256xf32, #tpu.memory_space<vmem>>, vector<2x64xf32>,
    %c0_9 = arith.constant 0 : index
    %c0_10 = arith.constant 0 : index
    %25 = vector.load %arg2[%c0_9, %c0_10] : memref<256x256xbf16, #tpu.memory_space<vmem>>, vector<256x256xbf16>
    %cst_11 = arith.constant dense<0.000000e+00> : vector<2x256xf32>
    %26 = tpu.matmul %3, %25, %cst_11 {dimension_numbers = #tpu.dot_dimension_numbers<[1], [0], [0], [1], [0, 0, 1, 1], [], []>} : vector<2x256xbf16>, vector<256x256xbf16>, vector<2x256xf32> -> vector<2x256xf32>
    %27 = vector.extract_strided_slice %26 {offsets = [0, 0], sizes = [2, 64], strides = [1, 1]} : vector<2x256xf32> to vector<2x64xf32>
    %28 = vector.extract_strided_slice %26 {offsets = [0, 64], sizes = [2, 64], strides = [1, 1]} : vector<2x256xf32> to vector<2x64xf32>
    %29 = arith.maximumf %27, %28 : vector<2x64xf32>
    %30 = vector.extract_strided_slice %26 {offsets = [0, 128], sizes = [2, 64], strides = [1, 1]} : vector<2x256xf32> to vector<2x64xf32>
    %31 = vector.extract_strided_slice %26 {offsets = [0, 192], sizes = [2, 64], strides = [1, 1]} : vector<2x256xf32> to vector<2x64xf32>
    %32 = arith.maximumf %30, %31 : vector<2x64xf32>
    %33 = arith.maximumf %29, %32 : vector<2x64xf32>
    %c0_12 = arith.constant 0 : index
    %c128 = arith.constant 128 : index
    %34 = vector.load %arg18[%c0_12, %c128] : memref<2x256xf32, #tpu.memory_space<vmem>>, vector<2x64xf32>
    tpu.vector_store %arg18[%c0_12, %c128], %33 {strides = array<i32>} : memref<2x256xf32, #tpu.memory_space<vmem>>, vector<2x64xf32>,
    %c0_13 = arith.constant 0 : index
    %c0_14 = arith.constant 0 : index
    %35 = vector.load %arg2[%c0_13, %c0_14] : memref<256x256xbf16, #tpu.memory_space<vmem>>, vector<256x256xbf16>
    %cst_15 = arith.constant dense<0.000000e+00> : vector<2x256xf32>
    %36 = tpu.matmul %4, %35, %cst_15 {dimension_numbers = #tpu.dot_dimension_numbers<[1], [0], [0], [1], [0, 0, 1, 1], [], []>} : vector<2x256xbf16>, vector<256x256xbf16>, vector<2x256xf32> -> vector<2x256xf32>
    %37 = vector.extract_strided_slice %36 {offsets = [0, 0], sizes = [2, 64], strides = [1, 1]} : vector<2x256xf32> to vector<2x64xf32>
    %38 = vector.extract_strided_slice %36 {offsets = [0, 64], sizes = [2, 64], strides = [1, 1]} : vector<2x256xf32> to vector<2x64xf32>
    %39 = arith.maximumf %37, %38 : vector<2x64xf32>
    %40 = vector.extract_strided_slice %36 {offsets = [0, 128], sizes = [2, 64], strides = [1, 1]} : vector<2x256xf32> to vector<2x64xf32>
    %41 = vector.extract_strided_slice %36 {offsets = [0, 192], sizes = [2, 64], strides = [1, 1]} : vector<2x256xf32> to vector<2x64xf32>
    %42 = arith.maximumf %40, %41 : vector<2x64xf32>
    %43 = arith.maximumf %39, %42 : vector<2x64xf32>
    %c0_16 = arith.constant 0 : index
    %c192 = arith.constant 192 : index
    %44 = vector.load %arg18[%c0_16, %c192] : memref<2x256xf32, #tpu.memory_space<vmem>>, vector<2x64xf32>
    tpu.vector_store %arg18[%c0_16, %c192], %43 {strides = array<i32>} : memref<2x256xf32, #tpu.memory_space<vmem>>, vector<2x64xf32>,
    %c0_17 = arith.constant 0 : index
    %c0_18 = arith.constant 0 : index
    %45 = vector.load %arg18[%c0_17, %c0_18] : memref<2x256xf32, #tpu.memory_space<vmem>>, vector<2x256xf32>
    %46 = arith.truncf %45 : vector<2x256xf32> to vector<2x256xbf16>
    %c0_19 = arith.constant 0 : index
    %c0_20 = arith.constant 0 : index
    %47 = vector.load %arg5[%c0_19, %c0_20] : memref<256x64xbf16, #tpu.memory_space<vmem>>, vector<256x64xbf16>
    %cst_21 = arith.constant dense<0.000000e+00> : vector<2x64xf32>
    %48 = tpu.matmul %46, %47, %cst_21 {dimension_numbers = #tpu.dot_dimension_numbers<[1], [0], [0], [1], [0, 0, 1, 1], [], []>} : vector<2x256xbf16>, vector<256x64xbf16>, vector<2x64xf32> -> vector<2x64xf32>
    %c0_22 = arith.constant 0 : index
    %49 = memref.load %arg16[%c0_22] : memref<6xf32, #tpu.memory_space<smem>>
    %50 = vector.broadcast %49 : f32 to vector<2x64xf32>
    %51 = arith.addf %48, %50 : vector<2x64xf32>
    %cst_23 = arith.constant 0.000000e+00 : f32
    %52 = vector.broadcast %cst_23 : f32 to vector<2x64xf32>
    %53 = arith.maximumf %51, %52 : vector<2x64xf32>
    %54 = arith.truncf %53 : vector<2x64xf32> to vector<2x64xbf16>
    %c0_24 = arith.constant 0 : index
    %c0_25 = arith.constant 0 : index
    %55 = vector.load %arg3[%c0_24, %c0_25] : memref<64x64xbf16, #tpu.memory_space<vmem>>, vector<64x64xbf16>
    %cst_26 = arith.constant dense<0.000000e+00> : vector<2x64xf32>
    %56 = tpu.matmul %54, %55, %cst_26 {dimension_numbers = #tpu.dot_dimension_numbers<[1], [0], [0], [1], [0, 0, 1, 1], [], []>} : vector<2x64xbf16>, vector<64x64xbf16>, vector<2x64xf32> -> vector<2x64xf32>
    %57 = vector.extract_strided_slice %56 {offsets = [0, 0], sizes = [2, 16], strides = [1, 1]} : vector<2x64xf32> to vector<2x16xf32>
    %58 = vector.extract_strided_slice %56 {offsets = [0, 16], sizes = [2, 16], strides = [1, 1]} : vector<2x64xf32> to vector<2x16xf32>
    %59 = arith.maximumf %57, %58 : vector<2x16xf32>
    %60 = vector.extract_strided_slice %56 {offsets = [0, 32], sizes = [2, 16], strides = [1, 1]} : vector<2x64xf32> to vector<2x16xf32>
    %61 = vector.extract_strided_slice %56 {offsets = [0, 48], sizes = [2, 16], strides = [1, 1]} : vector<2x64xf32> to vector<2x16xf32>
    %62 = arith.maximumf %60, %61 : vector<2x16xf32>
    %63 = arith.maximumf %59, %62 : vector<2x16xf32>
    %64 = arith.truncf %63 : vector<2x16xf32> to vector<2x16xbf16>
    %c0_27 = arith.constant 0 : index
    %c0_28 = arith.constant 0 : index
    %65 = vector.load %arg6[%c0_27, %c0_28] : memref<16x16xbf16, #tpu.memory_space<vmem>>, vector<16x16xbf16>
    %cst_29 = arith.constant dense<0.000000e+00> : vector<2x16xf32>
    %66 = tpu.matmul %64, %65, %cst_29 {dimension_numbers = #tpu.dot_dimension_numbers<[1], [0], [0], [1], [0, 0, 1, 1], [], []>} : vector<2x16xbf16>, vector<16x16xbf16>, vector<2x16xf32> -> vector<2x16xf32>
    %c1 = arith.constant 1 : index
    %67 = memref.load %arg16[%c1] : memref<6xf32, #tpu.memory_space<smem>>
    %68 = vector.broadcast %67 : f32 to vector<2x16xf32>
    %69 = arith.addf %66, %68 : vector<2x16xf32>
    %cst_30 = arith.constant 0.000000e+00 : f32
    %70 = vector.broadcast %cst_30 : f32 to vector<2x16xf32>
    %71 = arith.maximumf %69, %70 : vector<2x16xf32>
    %72 = arith.truncf %71 : vector<2x16xf32> to vector<2x16xbf16>
    %c0_31 = arith.constant 0 : index
    %c0_32 = arith.constant 0 : index
    %73 = vector.load %arg4[%c0_31, %c0_32] : memref<16x16xbf16, #tpu.memory_space<vmem>>, vector<16x16xbf16>
    %cst_33 = arith.constant dense<0.000000e+00> : vector<2x16xf32>
    %74 = tpu.matmul %72, %73, %cst_33 {dimension_numbers = #tpu.dot_dimension_numbers<[1], [0], [0], [1], [0, 0, 1, 1], [], []>} : vector<2x16xbf16>, vector<16x16xbf16>, vector<2x16xf32> -> vector<2x16xf32>
    %75 = vector.extract_strided_slice %74 {offsets = [0, 0], sizes = [2, 4], strides = [1, 1]} : vector<2x16xf32> to vector<2x4xf32>
    %76 = vector.extract_strided_slice %74 {offsets = [0, 4], sizes = [2, 4], strides = [1, 1]} : vector<2x16xf32> to vector<2x4xf32>
    %77 = arith.maximumf %75, %76 : vector<2x4xf32>
    %78 = vector.extract_strided_slice %74 {offsets = [0, 8], sizes = [2, 4], strides = [1, 1]} : vector<2x16xf32> to vector<2x4xf32>
    %79 = vector.extract_strided_slice %74 {offsets = [0, 12], sizes = [2, 4], strides = [1, 1]} : vector<2x16xf32> to vector<2x4xf32>
    %80 = arith.maximumf %78, %79 : vector<2x4xf32>
    %81 = arith.maximumf %77, %80 : vector<2x4xf32>
    %82 = arith.truncf %81 : vector<2x4xf32> to vector<2x4xbf16>
    %c0_34 = arith.constant 0 : index
    %c0_35 = arith.constant 0 : index
    %83 = vector.load %arg7[%c0_34, %c0_35] : memref<4x4xbf16, #tpu.memory_space<vmem>>, vector<4x4xbf16>
    %cst_36 = arith.constant dense<0.000000e+00> : vector<2x4xf32>
    %84 = tpu.matmul %82, %83, %cst_36 {dimension_numbers = #tpu.dot_dimension_numbers<[1], [0], [0], [1], [0, 0, 1, 1], [], []>} : vector<2x4xbf16>, vector<4x4xbf16>, vector<2x4xf32> -> vector<2x4xf32>
    %c2 = arith.constant 2 : index
    %85 = memref.load %arg16[%c2] : memref<6xf32, #tpu.memory_space<smem>>
    %86 = vector.broadcast %85 : f32 to vector<2x4xf32>
    %87 = arith.addf %84, %86 : vector<2x4xf32>
    %cst_37 = arith.constant 0.000000e+00 : f32
    %88 = vector.broadcast %cst_37 : f32 to vector<2x4xf32>
    %89 = arith.maximumf %87, %88 : vector<2x4xf32>
    %90 = arith.truncf %89 : vector<2x4xf32> to vector<2x4xbf16>
    %c0_38 = arith.constant 0 : index
    %c0_39 = arith.constant 0 : index
    %91 = vector.load %arg8[%c0_38, %c0_39] : memref<4x4xbf16, #tpu.memory_space<vmem>>, vector<4x4xbf16>
    %cst_40 = arith.constant dense<0.000000e+00> : vector<2x4xf32>
    %92 = tpu.matmul %90, %91, %cst_40 {dimension_numbers = #tpu.dot_dimension_numbers<[1], [0], [0], [1], [0, 0, 1, 1], [], []>} : vector<2x4xbf16>, vector<4x4xbf16>, vector<2x4xf32> -> vector<2x4xf32>
    %c3 = arith.constant 3 : index
    %93 = memref.load %arg16[%c3] : memref<6xf32, #tpu.memory_space<smem>>
    %94 = vector.broadcast %93 : f32 to vector<2x4xf32>
    %95 = arith.addf %92, %94 : vector<2x4xf32>
    %cst_41 = arith.constant 0.000000e+00 : f32
    %96 = vector.broadcast %cst_41 : f32 to vector<2x4xf32>
    %97 = arith.maximumf %95, %96 : vector<2x4xf32>
    %98 = arith.truncf %97 : vector<2x4xf32> to vector<2x4xbf16>
    %c0_42 = arith.constant 0 : index
    %c0_43 = arith.constant 0 : index
    %99 = vector.load %arg11[%c0_42, %c0_43] : memref<4x16xbf16, #tpu.memory_space<vmem>>, vector<4x16xbf16>
    %cst_44 = arith.constant dense<0.000000e+00> : vector<2x16xf32>
    %100 = tpu.matmul %98, %99, %cst_44 {dimension_numbers = #tpu.dot_dimension_numbers<[1], [0], [0], [1], [0, 0, 1, 1], [], []>} : vector<2x4xbf16>, vector<4x16xbf16>, vector<2x16xf32> -> vector<2x16xf32>
    %101 = arith.truncf %71 : vector<2x16xf32> to vector<2x16xbf16>
    %c0_45 = arith.constant 0 : index
    %c0_46 = arith.constant 0 : index
    %102 = vector.load %arg9[%c0_45, %c0_46] : memref<16x16xbf16, #tpu.memory_space<vmem>>, vector<16x16xbf16>
    %cst_47 = arith.constant dense<0.000000e+00> : vector<2x16xf32>
    %103 = tpu.matmul %101, %102, %cst_47 {dimension_numbers = #tpu.dot_dimension_numbers<[1], [0], [0], [1], [0, 0, 1, 1], [], []>} : vector<2x16xbf16>, vector<16x16xbf16>, vector<2x16xf32> -> vector<2x16xf32>
    %c4 = arith.constant 4 : index
    %104 = memref.load %arg16[%c4] : memref<6xf32, #tpu.memory_space<smem>>
    %105 = vector.broadcast %104 : f32 to vector<2x16xf32>
    %106 = arith.addf %103, %105 : vector<2x16xf32>
    %cst_48 = arith.constant 0.000000e+00 : f32
    %107 = vector.broadcast %cst_48 : f32 to vector<2x16xf32>
    %108 = arith.maximumf %106, %107 : vector<2x16xf32>
    %109 = arith.addf %108, %100 : vector<2x16xf32>
    %110 = arith.truncf %109 : vector<2x16xf32> to vector<2x16xbf16>
    %c0_49 = arith.constant 0 : index
    %c0_50 = arith.constant 0 : index
    %111 = vector.load %arg12[%c0_49, %c0_50] : memref<16x64xbf16, #tpu.memory_space<vmem>>, vector<16x64xbf16>
    %cst_51 = arith.constant dense<0.000000e+00> : vector<2x64xf32>
    %112 = tpu.matmul %110, %111, %cst_51 {dimension_numbers = #tpu.dot_dimension_numbers<[1], [0], [0], [1], [0, 0, 1, 1], [], []>} : vector<2x16xbf16>, vector<16x64xbf16>, vector<2x64xf32> -> vector<2x64xf32>
    %113 = arith.truncf %53 : vector<2x64xf32> to vector<2x64xbf16>
    %c0_52 = arith.constant 0 : index
    %c0_53 = arith.constant 0 : index
    %114 = vector.load %arg10[%c0_52, %c0_53] : memref<64x64xbf16, #tpu.memory_space<vmem>>, vector<64x64xbf16>
    %cst_54 = arith.constant dense<0.000000e+00> : vector<2x64xf32>
    %115 = tpu.matmul %113, %114, %cst_54 {dimension_numbers = #tpu.dot_dimension_numbers<[1], [0], [0], [1], [0, 0, 1, 1], [], []>} : vector<2x64xbf16>, vector<64x64xbf16>, vector<2x64xf32> -> vector<2x64xf32>
    %c5 = arith.constant 5 : index
    %116 = memref.load %arg16[%c5] : memref<6xf32, #tpu.memory_space<smem>>
    %117 = vector.broadcast %116 : f32 to vector<2x64xf32>
    %118 = arith.addf %115, %117 : vector<2x64xf32>
    %cst_55 = arith.constant 0.000000e+00 : f32
    %119 = vector.broadcast %cst_55 : f32 to vector<2x64xf32>
    %120 = arith.maximumf %118, %119 : vector<2x64xf32>
    %121 = arith.addf %120, %112 : vector<2x64xf32>
    %122 = arith.truncf %121 : vector<2x64xf32> to vector<2x64xbf16>
    %c0_56 = arith.constant 0 : index
    %c0_57 = arith.constant 0 : index
    %123 = vector.load %arg13[%c0_56, %c0_57] : memref<64x256xbf16, #tpu.memory_space<vmem>>, vector<64x256xbf16>
    %cst_58 = arith.constant dense<0.000000e+00> : vector<2x256xf32>
    %124 = tpu.matmul %122, %123, %cst_58 {dimension_numbers = #tpu.dot_dimension_numbers<[1], [0], [0], [1], [0, 0, 1, 1], [], []>} : vector<2x64xbf16>, vector<64x256xbf16>, vector<2x256xf32> -> vector<2x256xf32>
    %125 = arith.extf %1 : vector<2x256xbf16> to vector<2x256xf32>
    %126 = arith.extf %2 : vector<2x256xbf16> to vector<2x256xf32>
    %127 = arith.extf %3 : vector<2x256xbf16> to vector<2x256xf32>
    %128 = arith.extf %4 : vector<2x256xbf16> to vector<2x256xf32>
    %c0_59 = arith.constant 0 : index
    %129 = memref.load %arg15[%c0_59] : memref<8xf32, #tpu.memory_space<smem>>
    %c0_60 = arith.constant 0 : index
    %130 = memref.load %arg14[%c0_60] : memref<32xf32, #tpu.memory_space<smem>>
    %131 = vector.broadcast %130 : f32 to vector<2x256xf32>
    %132 = arith.mulf %131, %125 : vector<2x256xf32>
    %133 = vector.broadcast %129 : f32 to vector<2x256xf32>
    %134 = arith.addf %133, %132 : vector<2x256xf32>
    %c1_61 = arith.constant 1 : index
    %135 = memref.load %arg14[%c1_61] : memref<32xf32, #tpu.memory_space<smem>>
    %136 = vector.broadcast %135 : f32 to vector<2x256xf32>
    %137 = arith.mulf %136, %126 : vector<2x256xf32>
    %138 = arith.addf %134, %137 : vector<2x256xf32>
    %c2_62 = arith.constant 2 : index
    %139 = memref.load %arg14[%c2_62] : memref<32xf32, #tpu.memory_space<smem>>
    %140 = vector.broadcast %139 : f32 to vector<2x256xf32>
    %141 = arith.mulf %140, %127 : vector<2x256xf32>
    %142 = arith.addf %138, %141 : vector<2x256xf32>
    %c3_63 = arith.constant 3 : index
    %143 = memref.load %arg14[%c3_63] : memref<32xf32, #tpu.memory_space<smem>>
    %144 = vector.broadcast %143 : f32 to vector<2x256xf32>
    %145 = arith.mulf %144, %128 : vector<2x256xf32>
    %146 = arith.addf %142, %145 : vector<2x256xf32>
    %cst_64 = arith.constant 0.000000e+00 : f32
    %147 = vector.broadcast %cst_64 : f32 to vector<2x256xf32>
    %148 = arith.maximumf %146, %147 : vector<2x256xf32>
    %149 = arith.mulf %124, %148 : vector<2x256xf32>
    %c0_65 = arith.constant 0 : index
    %c0_66 = arith.constant 0 : index
    %150 = vector.load %arg17[%c0_65, %c0_66] : memref<2x2048xf32, #tpu.memory_space<vmem>>, vector<2x256xf32>
    tpu.vector_store %arg17[%c0_65, %c0_66], %149 {strides = array<i32>} : memref<2x2048xf32, #tpu.memory_space<vmem>>, vector<2x256xf32>,
    %c1_67 = arith.constant 1 : index
    %151 = memref.load %arg15[%c1_67] : memref<8xf32, #tpu.memory_space<smem>>
    %c4_68 = arith.constant 4 : index
    %152 = memref.load %arg14[%c4_68] : memref<32xf32, #tpu.memory_space<smem>>
    %153 = vector.broadcast %152 : f32 to vector<2x256xf32>
    %154 = arith.mulf %153, %125 : vector<2x256xf32>
    %155 = vector.broadcast %151 : f32 to vector<2x256xf32>
    %156 = arith.addf %155, %154 : vector<2x256xf32>
    %c5_69 = arith.constant 5 : index
    %157 = memref.load %arg14[%c5_69] : memref<32xf32, #tpu.memory_space<smem>>
    %158 = vector.broadcast %157 : f32 to vector<2x256xf32>
    %159 = arith.mulf %158, %126 : vector<2x256xf32>
    %160 = arith.addf %156, %159 : vector<2x256xf32>
    %c6 = arith.constant 6 : index
    %161 = memref.load %arg14[%c6] : memref<32xf32, #tpu.memory_space<smem>>
    %162 = vector.broadcast %161 : f32 to vector<2x256xf32>
    %163 = arith.mulf %162, %127 : vector<2x256xf32>
    %164 = arith.addf %160, %163 : vector<2x256xf32>
    %c7 = arith.constant 7 : index
    %165 = memref.load %arg14[%c7] : memref<32xf32, #tpu.memory_space<smem>>
    %166 = vector.broadcast %165 : f32 to vector<2x256xf32>
    %167 = arith.mulf %166, %128 : vector<2x256xf32>
    %168 = arith.addf %164, %167 : vector<2x256xf32>
    %cst_70 = arith.constant 0.000000e+00 : f32
    %169 = vector.broadcast %cst_70 : f32 to vector<2x256xf32>
    %170 = arith.maximumf %168, %169 : vector<2x256xf32>
    %171 = arith.mulf %124, %170 : vector<2x256xf32>
    %c0_71 = arith.constant 0 : index
    %c256 = arith.constant 256 : index
    %172 = vector.load %arg17[%c0_71, %c256] : memref<2x2048xf32, #tpu.memory_space<vmem>>, vector<2x256xf32>
    tpu.vector_store %arg17[%c0_71, %c256], %171 {strides = array<i32>} : memref<2x2048xf32, #tpu.memory_space<vmem>>, vector<2x256xf32>,
    %c2_72 = arith.constant 2 : index
    %173 = memref.load %arg15[%c2_72] : memref<8xf32, #tpu.memory_space<smem>>
    %c8 = arith.constant 8 : index
    %174 = memref.load %arg14[%c8] : memref<32xf32, #tpu.memory_space<smem>>
    %175 = vector.broadcast %174 : f32 to vector<2x256xf32>
    %176 = arith.mulf %175, %125 : vector<2x256xf32>
    %177 = vector.broadcast %173 : f32 to vector<2x256xf32>
    %178 = arith.addf %177, %176 : vector<2x256xf32>
    %c9 = arith.constant 9 : index
    %179 = memref.load %arg14[%c9] : memref<32xf32, #tpu.memory_space<smem>>
    %180 = vector.broadcast %179 : f32 to vector<2x256xf32>
    %181 = arith.mulf %180, %126 : vector<2x256xf32>
    %182 = arith.addf %178, %181 : vector<2x256xf32>
    %c10 = arith.constant 10 : index
    %183 = memref.load %arg14[%c10] : memref<32xf32, #tpu.memory_space<smem>>
    %184 = vector.broadcast %183 : f32 to vector<2x256xf32>
    %185 = arith.mulf %184, %127 : vector<2x256xf32>
    %186 = arith.addf %182, %185 : vector<2x256xf32>
    %c11 = arith.constant 11 : index
    %187 = memref.load %arg14[%c11] : memref<32xf32, #tpu.memory_space<smem>>
    %188 = vector.broadcast %187 : f32 to vector<2x256xf32>
    %189 = arith.mulf %188, %128 : vector<2x256xf32>
    %190 = arith.addf %186, %189 : vector<2x256xf32>
    %cst_73 = arith.constant 0.000000e+00 : f32
    %191 = vector.broadcast %cst_73 : f32 to vector<2x256xf32>
    %192 = arith.maximumf %190, %191 : vector<2x256xf32>
    %193 = arith.mulf %124, %192 : vector<2x256xf32>
    %c0_74 = arith.constant 0 : index
    %c512 = arith.constant 512 : index
    %194 = vector.load %arg17[%c0_74, %c512] : memref<2x2048xf32, #tpu.memory_space<vmem>>, vector<2x256xf32>
    tpu.vector_store %arg17[%c0_74, %c512], %193 {strides = array<i32>} : memref<2x2048xf32, #tpu.memory_space<vmem>>, vector<2x256xf32>,
    %c3_75 = arith.constant 3 : index
    %195 = memref.load %arg15[%c3_75] : memref<8xf32, #tpu.memory_space<smem>>
    %c12 = arith.constant 12 : index
    %196 = memref.load %arg14[%c12] : memref<32xf32, #tpu.memory_space<smem>>
    %197 = vector.broadcast %196 : f32 to vector<2x256xf32>
    %198 = arith.mulf %197, %125 : vector<2x256xf32>
    %199 = vector.broadcast %195 : f32 to vector<2x256xf32>
    %200 = arith.addf %199, %198 : vector<2x256xf32>
    %c13 = arith.constant 13 : index
    %201 = memref.load %arg14[%c13] : memref<32xf32, #tpu.memory_space<smem>>
    %202 = vector.broadcast %201 : f32 to vector<2x256xf32>
    %203 = arith.mulf %202, %126 : vector<2x256xf32>
    %204 = arith.addf %200, %203 : vector<2x256xf32>
    %c14 = arith.constant 14 : index
    %205 = memref.load %arg14[%c14] : memref<32xf32, #tpu.memory_space<smem>>
    %206 = vector.broadcast %205 : f32 to vector<2x256xf32>
    %207 = arith.mulf %206, %127 : vector<2x256xf32>
    %208 = arith.addf %204, %207 : vector<2x256xf32>
    %c15 = arith.constant 15 : index
    %209 = memref.load %arg14[%c15] : memref<32xf32, #tpu.memory_space<smem>>
    %210 = vector.broadcast %209 : f32 to vector<2x256xf32>
    %211 = arith.mulf %210, %128 : vector<2x256xf32>
    %212 = arith.addf %208, %211 : vector<2x256xf32>
    %cst_76 = arith.constant 0.000000e+00 : f32
    %213 = vector.broadcast %cst_76 : f32 to vector<2x256xf32>
    %214 = arith.maximumf %212, %213 : vector<2x256xf32>
    %215 = arith.mulf %124, %214 : vector<2x256xf32>
    %c0_77 = arith.constant 0 : index
    %c768 = arith.constant 768 : index
    %216 = vector.load %arg17[%c0_77, %c768] : memref<2x2048xf32, #tpu.memory_space<vmem>>, vector<2x256xf32>
    tpu.vector_store %arg17[%c0_77, %c768], %215 {strides = array<i32>} : memref<2x2048xf32, #tpu.memory_space<vmem>>, vector<2x256xf32>,
    %c4_78 = arith.constant 4 : index
    %217 = memref.load %arg15[%c4_78] : memref<8xf32, #tpu.memory_space<smem>>
    %c16 = arith.constant 16 : index
    %218 = memref.load %arg14[%c16] : memref<32xf32, #tpu.memory_space<smem>>
    %219 = vector.broadcast %218 : f32 to vector<2x256xf32>
    %220 = arith.mulf %219, %125 : vector<2x256xf32>
    %221 = vector.broadcast %217 : f32 to vector<2x256xf32>
    %222 = arith.addf %221, %220 : vector<2x256xf32>
    %c17 = arith.constant 17 : index
    %223 = memref.load %arg14[%c17] : memref<32xf32, #tpu.memory_space<smem>>
    %224 = vector.broadcast %223 : f32 to vector<2x256xf32>
    %225 = arith.mulf %224, %126 : vector<2x256xf32>
    %226 = arith.addf %222, %225 : vector<2x256xf32>
    %c18 = arith.constant 18 : index
    %227 = memref.load %arg14[%c18] : memref<32xf32, #tpu.memory_space<smem>>
    %228 = vector.broadcast %227 : f32 to vector<2x256xf32>
    %229 = arith.mulf %228, %127 : vector<2x256xf32>
    %230 = arith.addf %226, %229 : vector<2x256xf32>
    %c19 = arith.constant 19 : index
    %231 = memref.load %arg14[%c19] : memref<32xf32, #tpu.memory_space<smem>>
    %232 = vector.broadcast %231 : f32 to vector<2x256xf32>
    %233 = arith.mulf %232, %128 : vector<2x256xf32>
    %234 = arith.addf %230, %233 : vector<2x256xf32>
    %cst_79 = arith.constant 0.000000e+00 : f32
    %235 = vector.broadcast %cst_79 : f32 to vector<2x256xf32>
    %236 = arith.maximumf %234, %235 : vector<2x256xf32>
    %237 = arith.mulf %124, %236 : vector<2x256xf32>
    %c0_80 = arith.constant 0 : index
    %c1024 = arith.constant 1024 : index
    %238 = vector.load %arg17[%c0_80, %c1024] : memref<2x2048xf32, #tpu.memory_space<vmem>>, vector<2x256xf32>
    tpu.vector_store %arg17[%c0_80, %c1024], %237 {strides = array<i32>} : memref<2x2048xf32, #tpu.memory_space<vmem>>, vector<2x256xf32>,
    %c5_81 = arith.constant 5 : index
    %239 = memref.load %arg15[%c5_81] : memref<8xf32, #tpu.memory_space<smem>>
    %c20 = arith.constant 20 : index
    %240 = memref.load %arg14[%c20] : memref<32xf32, #tpu.memory_space<smem>>
    %241 = vector.broadcast %240 : f32 to vector<2x256xf32>
    %242 = arith.mulf %241, %125 : vector<2x256xf32>
    %243 = vector.broadcast %239 : f32 to vector<2x256xf32>
    %244 = arith.addf %243, %242 : vector<2x256xf32>
    %c21 = arith.constant 21 : index
    %245 = memref.load %arg14[%c21] : memref<32xf32, #tpu.memory_space<smem>>
    %246 = vector.broadcast %245 : f32 to vector<2x256xf32>
    %247 = arith.mulf %246, %126 : vector<2x256xf32>
    %248 = arith.addf %244, %247 : vector<2x256xf32>
    %c22 = arith.constant 22 : index
    %249 = memref.load %arg14[%c22] : memref<32xf32, #tpu.memory_space<smem>>
    %250 = vector.broadcast %249 : f32 to vector<2x256xf32>
    %251 = arith.mulf %250, %127 : vector<2x256xf32>
    %252 = arith.addf %248, %251 : vector<2x256xf32>
    %c23 = arith.constant 23 : index
    %253 = memref.load %arg14[%c23] : memref<32xf32, #tpu.memory_space<smem>>
    %254 = vector.broadcast %253 : f32 to vector<2x256xf32>
    %255 = arith.mulf %254, %128 : vector<2x256xf32>
    %256 = arith.addf %252, %255 : vector<2x256xf32>
    %cst_82 = arith.constant 0.000000e+00 : f32
    %257 = vector.broadcast %cst_82 : f32 to vector<2x256xf32>
    %258 = arith.maximumf %256, %257 : vector<2x256xf32>
    %259 = arith.mulf %124, %258 : vector<2x256xf32>
    %c0_83 = arith.constant 0 : index
    %c1280 = arith.constant 1280 : index
    %260 = vector.load %arg17[%c0_83, %c1280] : memref<2x2048xf32, #tpu.memory_space<vmem>>, vector<2x256xf32>
    tpu.vector_store %arg17[%c0_83, %c1280], %259 {strides = array<i32>} : memref<2x2048xf32, #tpu.memory_space<vmem>>, vector<2x256xf32>,
    %c6_84 = arith.constant 6 : index
    %261 = memref.load %arg15[%c6_84] : memref<8xf32, #tpu.memory_space<smem>>
    %c24 = arith.constant 24 : index
    %262 = memref.load %arg14[%c24] : memref<32xf32, #tpu.memory_space<smem>>
    %263 = vector.broadcast %262 : f32 to vector<2x256xf32>
    %264 = arith.mulf %263, %125 : vector<2x256xf32>
    %265 = vector.broadcast %261 : f32 to vector<2x256xf32>
    %266 = arith.addf %265, %264 : vector<2x256xf32>
    %c25 = arith.constant 25 : index
    %267 = memref.load %arg14[%c25] : memref<32xf32, #tpu.memory_space<smem>>
    %268 = vector.broadcast %267 : f32 to vector<2x256xf32>
    %269 = arith.mulf %268, %126 : vector<2x256xf32>
    %270 = arith.addf %266, %269 : vector<2x256xf32>
    %c26 = arith.constant 26 : index
    %271 = memref.load %arg14[%c26] : memref<32xf32, #tpu.memory_space<smem>>
    %272 = vector.broadcast %271 : f32 to vector<2x256xf32>
    %273 = arith.mulf %272, %127 : vector<2x256xf32>
    %274 = arith.addf %270, %273 : vector<2x256xf32>
    %c27 = arith.constant 27 : index
    %275 = memref.load %arg14[%c27] : memref<32xf32, #tpu.memory_space<smem>>
    %276 = vector.broadcast %275 : f32 to vector<2x256xf32>
    %277 = arith.mulf %276, %128 : vector<2x256xf32>
    %278 = arith.addf %274, %277 : vector<2x256xf32>
    %cst_85 = arith.constant 0.000000e+00 : f32
    %279 = vector.broadcast %cst_85 : f32 to vector<2x256xf32>
    %280 = arith.maximumf %278, %279 : vector<2x256xf32>
    %281 = arith.mulf %124, %280 : vector<2x256xf32>
    %c0_86 = arith.constant 0 : index
    %c1536 = arith.constant 1536 : index
    %282 = vector.load %arg17[%c0_86, %c1536] : memref<2x2048xf32, #tpu.memory_space<vmem>>, vector<2x256xf32>
    tpu.vector_store %arg17[%c0_86, %c1536], %281 {strides = array<i32>} : memref<2x2048xf32, #tpu.memory_space<vmem>>, vector<2x256xf32>,
    %c7_87 = arith.constant 7 : index
    %283 = memref.load %arg15[%c7_87] : memref<8xf32, #tpu.memory_space<smem>>
    %c28 = arith.constant 28 : index
    %284 = memref.load %arg14[%c28] : memref<32xf32, #tpu.memory_space<smem>>
    %285 = vector.broadcast %284 : f32 to vector<2x256xf32>
    %286 = arith.mulf %285, %125 : vector<2x256xf32>
    %287 = vector.broadcast %283 : f32 to vector<2x256xf32>
    %288 = arith.addf %287, %286 : vector<2x256xf32>
    %c29 = arith.constant 29 : index
    %289 = memref.load %arg14[%c29] : memref<32xf32, #tpu.memory_space<smem>>
    %290 = vector.broadcast %289 : f32 to vector<2x256xf32>
    %291 = arith.mulf %290, %126 : vector<2x256xf32>
    %292 = arith.addf %288, %291 : vector<2x256xf32>
    %c30 = arith.constant 30 : index
    %293 = memref.load %arg14[%c30] : memref<32xf32, #tpu.memory_space<smem>>
    %294 = vector.broadcast %293 : f32 to vector<2x256xf32>
    %295 = arith.mulf %294, %127 : vector<2x256xf32>
    %296 = arith.addf %292, %295 : vector<2x256xf32>
    %c31 = arith.constant 31 : index
    %297 = memref.load %arg14[%c31] : memref<32xf32, #tpu.memory_space<smem>>
    %298 = vector.broadcast %297 : f32 to vector<2x256xf32>
    %299 = arith.mulf %298, %128 : vector<2x256xf32>
    %300 = arith.addf %296, %299 : vector<2x256xf32>
    %cst_88 = arith.constant 0.000000e+00 : f32
    %301 = vector.broadcast %cst_88 : f32 to vector<2x256xf32>
    %302 = arith.maximumf %300, %301 : vector<2x256xf32>
    %303 = arith.mulf %124, %302 : vector<2x256xf32>
    %c0_89 = arith.constant 0 : index
    %c1792 = arith.constant 1792 : index
    %304 = vector.load %arg17[%c0_89, %c1792] : memref<2x2048xf32, #tpu.memory_space<vmem>>, vector<2x256xf32>
    tpu.vector_store %arg17[%c0_89, %c1792], %303 {strides = array<i32>} : memref<2x2048xf32, #tpu.memory_space<vmem>>, vector<2x256xf32>,
    return
  }
  func.func @transform_0(%arg0: i32) -> (i32, i32) {
    %c0_i32 = arith.constant 0 : i32
    %c0_i32_0 = arith.constant 0 : i32
    return %arg0, %c0_i32 : i32, i32
  }
  func.func @transform_1(%arg0: i32) -> (i32, i32) {
    %c0_i32 = arith.constant 0 : i32
    %c0_i32_0 = arith.constant 0 : i32
    %c0_i32_1 = arith.constant 0 : i32
    return %c0_i32, %c0_i32_0 : i32, i32
  }
  func.func @transform_2(%arg0: i32) -> (i32, i32) {
    %c0_i32 = arith.constant 0 : i32
    %c0_i32_0 = arith.constant 0 : i32
    %c0_i32_1 = arith.constant 0 : i32
    return %c0_i32, %c0_i32_0 : i32, i32
  }
  func.func @transform_3(%arg0: i32) -> (i32, i32) {
    %c0_i32 = arith.constant 0 : i32
    %c0_i32_0 = arith.constant 0 : i32
    %c0_i32_1 = arith.constant 0 : i32
    return %c0_i32, %c0_i32_0 : i32, i32
  }
  func.func @transform_4(%arg0: i32) -> (i32, i32) {
    %c0_i32 = arith.constant 0 : i32
    %c0_i32_0 = arith.constant 0 : i32
    %c0_i32_1 = arith.constant 0 : i32
    return %c0_i32, %c0_i32_0 : i32, i32
  }
  func.func @transform_5(%arg0: i32) -> (i32, i32) {
    %c0_i32 = arith.constant 0 : i32
    %c0_i32_0 = arith.constant 0 : i32
    %c0_i32_1 = arith.constant 0 : i32
    return %c0_i32, %c0_i32_0 : i32, i32
  }
  func.func @transform_6(%arg0: i32) -> (i32, i32) {
    %c0_i32 = arith.constant 0 : i32
    %c0_i32_0 = arith.constant 0 : i32
    %c0_i32_1 = arith.constant 0 : i32
    return %c0_i32, %c0_i32_0 : i32, i32
  }
  func.func @transform_7(%arg0: i32) -> (i32, i32) {
    %c0_i32 = arith.constant 0 : i32
    %c0_i32_0 = arith.constant 0 : i32
    %c0_i32_1 = arith.constant 0 : i32
    return %c0_i32, %c0_i32_0 : i32, i32
  }
  func.func @transform_8(%arg0: i32) -> (i32, i32) {
    %c0_i32 = arith.constant 0 : i32
    %c0_i32_0 = arith.constant 0 : i32
    %c0_i32_1 = arith.constant 0 : i32
    return %c0_i32, %c0_i32_0 : i32, i32
  }
  func.func @transform_9(%arg0: i32) -> (i32, i32) {
    %c0_i32 = arith.constant 0 : i32
    %c0_i32_0 = arith.constant 0 : i32
    %c0_i32_1 = arith.constant 0 : i32
    return %c0_i32, %c0_i32_0 : i32, i32
  }
  func.func @transform_10(%arg0: i32) -> (i32, i32) {
    %c0_i32 = arith.constant 0 : i32
    %c0_i32_0 = arith.constant 0 : i32
    %c0_i32_1 = arith.constant 0 : i32
    return %c0_i32, %c0_i32_0 : i32, i32
  }
  func.func @transform_11(%arg0: i32) -> (i32, i32) {
    %c0_i32 = arith.constant 0 : i32
    %c0_i32_0 = arith.constant 0 : i32
    %c0_i32_1 = arith.constant 0 : i32
    return %c0_i32, %c0_i32_0 : i32, i32
  }
  func.func @transform_12(%arg0: i32) -> (i32, i32) {
    %c0_i32 = arith.constant 0 : i32
    %c0_i32_0 = arith.constant 0 : i32
    %c0_i32_1 = arith.constant 0 : i32
    return %c0_i32, %c0_i32_0 : i32, i32
  }
  func.func @transform_13(%arg0: i32) -> i32 {
    %c0_i32 = arith.constant 0 : i32
    %c0_i32_0 = arith.constant 0 : i32
    return %c0_i32 : i32
  }
  func.func @transform_14(%arg0: i32) -> i32 {
    %c0_i32 = arith.constant 0 : i32
    %c0_i32_0 = arith.constant 0 : i32
    return %c0_i32 : i32
  }
  func.func @transform_15(%arg0: i32) -> i32 {
    %c0_i32 = arith.constant 0 : i32
    %c0_i32_0 = arith.constant 0 : i32
    return %c0_i32 : i32
  }
  func.func @transform_16(%arg0: i32) -> (i32, i32) {
    %c0_i32 = arith.constant 0 : i32
    %c0_i32_0 = arith.constant 0 : i32
    return %arg0, %c0_i32 : i32, i32
  }
}

</mosaic_0001>

<bundles_post_ra>
// kernel: pyramid_attention_forward.1
= control target key start
LH: loop header
LB: loop body
LE: loop exit
PB: predicated region body
PF: predicated region fallthrough
CT: control target
= control target key end

     0   :  { %s3339_s0 = inlined_call_operand.vmem [shape: bf16[2,1024], index: 0, kind: input, shape index: {}]   ;;  %s3340_s1 = inlined_call_operand.hbm [shape: bf16[256,256], index: 1, kind: input, shape index: {}]   ;;  %s3341_s2 = inlined_call_operand.vmem [shape: bf16[64,64], index: 2, kind: input, shape index: {}]   ;;  %s3342_s3 = inlined_call_operand.vmem [shape: bf16[16,16], index: 3, kind: input, shape index: {}]   ;;  %s3343_s4 = inlined_call_operand.vmem [shape: bf16[256,64], index: 4, kind: input, shape index: {}]   ;;  %s3344_s5 = inlined_call_operand.vmem [shape: bf16[16,16], index: 5, kind: input, shape index: {}]   ;;  %s3345_s6 = inlined_call_operand.vmem [shape: bf16[4,4], index: 6, kind: input, shape index: {}]   ;;  %s3346_s7 = inlined_call_operand.vmem [shape: bf16[4,4], index: 7, kind: input, shape index: {}]   ;;  %s3347_s8 = inlined_call_operand.vmem [shape: bf16[16,16], index: 8, kind: input, shape index: {}]   ;;  %s3348_s9 = inlined_call_operand.vmem [shape: bf16[64,64], index: 9, kind: input, shape index: {}]   ;;  %s3349_s10 = inlined_call_operand.vmem [shape: bf16[4,16], index: 10, kind: input, shape index: {}]   ;;  %s3350_s11 = inlined_call_operand.vmem [shape: bf16[16,64], index: 11, kind: input, shape index: {}]   ;;  %s3351_s12 = inlined_call_operand.vmem [shape: bf16[64,256], index: 12, kind: input, shape index: {}]   ;;  %s3352_s13 = inlined_call_operand.vmem [shape: f32[32], index: 13, kind: input, shape index: {}]   ;;  %s3353_s14 = inlined_call_operand.vmem [shape: f32[8], index: 14, kind: input, shape index: {}]   ;;  %s3354_s15 = inlined_call_operand.vmem [shape: f32[6], index: 15, kind: input, shape index: {}]   ;;  %s3355_s16 = inlined_call_operand.vmem [shape: f32[2,2048], index: 16, kind: output, shape index: {}]  }
   0x1   :  { %3356 = sst [smem:[#allocation13_spill]] %s3339_s0 }
   0x2   :  { %21 = vsyncpa [#allocation4], 0 }
   0x3   :  { %22 = vsyncpa [#allocation5], 0 }
   0x4   :  { %23 = vsyncpa [#allocation8], 0  ;;  %s75_s23 = sshll.u32 %s3353_s14, 4  ;;  %s30_s26 = sshll.u32 %s3340_s1, 4  ;;  %s76_s23 = int_to_ptr.vmem [resolvable:$true] %s75_s23  ;;  %s31_s26 = int_to_ptr.hbm [resolvable:$true] %s30_s26 }
   0x5   :  { %s2933_s27 = smov [#allocation7]   ;;  %s2934_s28 = smov [#allocation3]  }
   0x6   :  { %78 = dma.vmem_to_smem %s76_s23, 16, %s2933_s27, [#allocation8]  }
   0x7   :  { %s32_s29 = sshll.u32 %s2934_s28, 4  ;;  %s2935_s30 = smov 128   ;;  %s33_s29 = int_to_ptr.vmem [resolvable:$true] %s32_s29 }
   0x8   :  { %s2936_s0 = smov 8   ;;  %s66_s19 = sshll.u32 %s3352_s13, 4  ;;  %s67_s19 = int_to_ptr.vmem [resolvable:$true] %s66_s19 }
   0x9   :  { %38 = dma.hbm_to_vmem [thread:$0]  %s31_s26, 4096, %s33_s29, [#allocation4], %s2935_s30, %s2935_s30, %s2936_s0  }
   0xa   :  { %s84_s21 = sshll.u32 %s3354_s15, 4  ;;  %s2937_s22 = smov [#allocation6]   ;;  %s85_s21 = int_to_ptr.vmem [resolvable:$true] %s84_s21 }
   0xb   :  { %69 = dma.vmem_to_smem %s67_s19, 16, %s2937_s22, [#allocation5]  }
   0xc   :  { %s2938_s1 = smov [#allocation9]  }
   0xd   :  { %87 = dma.vmem_to_smem %s85_s21, 16, %s2938_s1, [#allocation8]  }
   0xe   :  { %2927 = dma.done.wait [#allocation4], 4096  }
   0xf   :  { %2928 = vsyncadd [#allocation4], 4294963200 }
  0x10   :  { %2929 = dma.done.wait [#allocation5], 16  }
  0x11   :  { %2930 = vsyncadd [#allocation5], 4294967280 }
  0x12   :  { %2931 = dma.done.wait [#allocation8], 32  }
  0x13   :  { %2932 = vsyncadd [#allocation8], 4294967264 }
  0x14   :  { %104 = sfence }
  0x15   :  { %v2040_v0 = vld [vmem:[#allocation3 + $0x70] sm:$0xf]  ;;  %v2707_v1 = vld [vmem:[#allocation3 + $0x74] sm:$0xf0]  ;;  %v2706_v5 = vld [vmem:[#allocation3 + $0x74] sm:$0xf] }
  0x16   :  { %v2104_v2 = vld [vmem:[#allocation3 + $0xf0] sm:$0xf]  ;;  %v2041_v3 = vor.u32 %v2707_v1, %v2040_v0  ;;  %v2723_v4 = vld [vmem:[#allocation3 + $0xf4] sm:$0xf0]  ;;  %v2042_v6 = vld [vmem:[#allocation3 + $0x78] sm:$0xf0] }
  0x17   :  { %v2105_v7 = vor.u32 %v2723_v4, %v2104_v2  ;;  %v2045_v8 = vor.u32 %v2706_v5, %v2042_v6  ;;  %v2722_v9 = vld [vmem:[#allocation3 + $0xf4] sm:$0xf]  ;;  %v2106_v10 = vld [vmem:[#allocation3 + $0xf8] sm:$0xf0]  ;;  %v2032_v11 = vld [vmem:[#allocation3 + $0x60] sm:$0xf] }
  0x18   :  { %305 = vmatpush.bf16.msra.mxu0 %v2041_v3  ;;  %v2109_v12 = vor.u32 %v2722_v9, %v2106_v10  ;;  %v2705_v13 = vld [vmem:[#allocation3 + $0x64] sm:$0xf0]  ;;  %v2096_v14 = vld [vmem:[#allocation3 + $0xe0] sm:$0xf]  ;;  %v2704_v18 = vld [vmem:[#allocation3 + $0x64] sm:$0xf] }
  0x19   :  { %v2721_v15 = vld [vmem:[#allocation3 + $0xe4] sm:$0xf0]  ;;  %318 = vmatpush.bf16.msra.mxu1 %v2105_v7  ;;  %331 = vmatpush.bf16.msra.mxu2 %v2045_v8  ;;  %v2033_v16 = vor.u32 %v2705_v13, %v2032_v11  ;;  %v2034_v19 = vld [vmem:[#allocation3 + $0x68] sm:$0xf0]  ;;  %v2720_v20 = vld [vmem:[#allocation3 + $0xe4] sm:$0xf] }
  0x1a   :  { %v2097_v17 = vor.u32 %v2721_v15, %v2096_v14  ;;  %344 = vmatpush.bf16.msra.mxu3 %v2109_v12  ;;  %v2037_v21 = vor.u32 %v2704_v18, %v2034_v19  ;;  %v2098_v22 = vld [vmem:[#allocation3 + $0xe8] sm:$0xf0]  ;;  %v2024_v23 = vld [vmem:[#allocation3 + $0x50] sm:$0xf]  ;;  %v2703_v24 = vld [vmem:[#allocation3 + $0x54] sm:$0xf0] }
  0x1b   :  { %v2101_v25 = vor.u32 %v2720_v20, %v2098_v22  ;;  %v2088_v26 = vld [vmem:[#allocation3 + $0xd0] sm:$0xf]  ;;  %v2719_v27 = vld [vmem:[#allocation3 + $0xd4] sm:$0xf0]  ;;  %v2702_v28 = vld [vmem:[#allocation3 + $0x54] sm:$0xf]  ;;  %v2025_v29 = vor.u32 %v2703_v24, %v2024_v23 }
  0x1c   :  { %306 = vmatpush.bf16.msra.mxu0 %v2033_v16  ;;  %v2026_v30 = vld [vmem:[#allocation3 + $0x58] sm:$0xf0]  ;;  %v2718_v31 = vld [vmem:[#allocation3 + $0xd4] sm:$0xf]  ;;  %v2089_v33 = vor.u32 %v2719_v27, %v2088_v26  ;;  %v2016_v35 = vld [vmem:[#allocation3 + $0x40] sm:$0xf] }
  0x1d   :  { %v2090_v32 = vld [vmem:[#allocation3 + $0xd8] sm:$0xf0]  ;;  %319 = vmatpush.bf16.msra.mxu1 %v2097_v17  ;;  %332 = vmatpush.bf16.msra.mxu2 %v2037_v21  ;;  %v2029_v34 = vor.u32 %v2702_v28, %v2026_v30  ;;  %v2701_v36 = vld [vmem:[#allocation3 + $0x44] sm:$0xf0]  ;;  %v2080_v37 = vld [vmem:[#allocation3 + $0xc0] sm:$0xf] }
  0x1e   :  { %345 = vmatpush.bf16.msra.mxu3 %v2101_v25  ;;  %v2093_v38 = vor.u32 %v2718_v31, %v2090_v32  ;;  %v2717_v39 = vld [vmem:[#allocation3 + $0xc4] sm:$0xf0]  ;;  %v2700_v40 = vld [vmem:[#allocation3 + $0x44] sm:$0xf]  ;;  %v2018_v41 = vld [vmem:[#allocation3 + $0x48] sm:$0xf0]  ;;  %v2017_v44 = vor.u32 %v2701_v36, %v2016_v35 }
  0x1f   :  { %v2716_v42 = vld [vmem:[#allocation3 + $0xc4] sm:$0xf]  ;;  %v2082_v43 = vld [vmem:[#allocation3 + $0xc8] sm:$0xf0]  ;;  %v2081_v45 = vor.u32 %v2717_v39, %v2080_v37  ;;  %v2021_v46 = vor.u32 %v2700_v40, %v2018_v41  ;;  %v2008_v47 = vld [vmem:[#allocation3 + $0x30] sm:$0xf] }
  0x20   :  { %307 = vmatpush.bf16.msra.mxu0 %v2025_v29  ;;  %v2699_v48 = vld [vmem:[#allocation3 + $0x34] sm:$0xf0]  ;;  %v2072_v49 = vld [vmem:[#allocation3 + $0xb0] sm:$0xf]  ;;  %v2085_v50 = vor.u32 %v2716_v42, %v2082_v43  ;;  %v2698_v52 = vld [vmem:[#allocation3 + $0x34] sm:$0xf] }
  0x21   :  { %320 = vmatpush.bf16.msra.mxu1 %v2089_v33  ;;  %333 = vmatpush.bf16.msra.mxu2 %v2029_v34  ;;  %v2715_v51 = vld [vmem:[#allocation3 + $0xb4] sm:$0xf0]  ;;  %v2010_v53 = vld [vmem:[#allocation3 + $0x38] sm:$0xf0]  ;;  %v2714_v54 = vld [vmem:[#allocation3 + $0xb4] sm:$0xf]  ;;  %v2009_v56 = vor.u32 %v2699_v48, %v2008_v47 }
  0x22   :  { %346 = vmatpush.bf16.msra.mxu3 %v2093_v38  ;;  %v2074_v55 = vld [vmem:[#allocation3 + $0xb8] sm:$0xf0]  ;;  %v2073_v57 = vor.u32 %v2715_v51, %v2072_v49  ;;  %v2013_v58 = vor.u32 %v2698_v52, %v2010_v53  ;;  %v2000_v59 = vld [vmem:[#allocation3 + $0x20] sm:$0xf]  ;;  %v2697_v60 = vld [vmem:[#allocation3 + $0x24] sm:$0xf0] }
  0x23   :  { %v2064_v61 = vld [vmem:[#allocation3 + $0xa0] sm:$0xf]  ;;  %v2077_v62 = vor.u32 %v2714_v54, %v2074_v55  ;;  %v2713_v63 = vld [vmem:[#allocation3 + $0xa4] sm:$0xf0]  ;;  %v2696_v0 = vld [vmem:[#allocation3 + $0x24] sm:$0xf]  ;;  %v2001_v4 = vor.u32 %v2697_v60, %v2000_v59 }
  0x24   :  { %308 = vmatpush.bf16.msra.mxu0 %v2017_v44  ;;  %v2002_v1 = vld [vmem:[#allocation3 + $0x28] sm:$0xf0]  ;;  %v2712_v2 = vld [vmem:[#allocation3 + $0xa4] sm:$0xf]  ;;  %v2065_v5 = vor.u32 %v2713_v63, %v2064_v61  ;;  %v1992_v7 = vld [vmem:[#allocation3 + $0x10] sm:$0xf] }
  0x25   :  { %321 = vmatpush.bf16.msra.mxu1 %v2081_v45  ;;  %334 = vmatpush.bf16.msra.mxu2 %v2021_v46  ;;  %v2066_v3 = vld [vmem:[#allocation3 + $0xa8] sm:$0xf0]  ;;  %v2005_v6 = vor.u32 %v2696_v0, %v2002_v1  ;;  %v2695_v8 = vld [vmem:[#allocation3 + $0x14] sm:$0xf0]  ;;  %v2056_v9 = vld [vmem:[#allocation3 + $0x90] sm:$0xf] }
  0x26   :  { %347 = vmatpush.bf16.msra.mxu3 %v2085_v50  ;;  %v2069_v10 = vor.u32 %v2712_v2, %v2066_v3  ;;  %v2711_v11 = vld [vmem:[#allocation3 + $0x94] sm:$0xf0]  ;;  %v2694_v12 = vld [vmem:[#allocation3 + $0x14] sm:$0xf]  ;;  %v1994_v13 = vld [vmem:[#allocation3 + $0x18] sm:$0xf0]  ;;  %v1993_v17 = vor.u32 %v2695_v8, %v1992_v7 }
  0x27   :  { %v2710_v14 = vld [vmem:[#allocation3 + $0x94] sm:$0xf]  ;;  %v2058_v15 = vld [vmem:[#allocation3 + $0x98] sm:$0xf0]  ;;  %v1984_v16 = vld [vmem:[#allocation3] sm:$0xf]  ;;  %v2057_v21 = vor.u32 %v2711_v11, %v2056_v9  ;;  %v1997_v22 = vor.u32 %v2694_v12, %v1994_v13 }
  0x28   :  { %309 = vmatpush.bf16.msra.mxu0 %v2009_v56  ;;  %v2693_v18 = vld [vmem:[#allocation3 + $0x4] sm:$0xf0]  ;;  %v2048_v19 = vld [vmem:[#allocation3 + $0x80] sm:$0xf]  ;;  %v2692_v23 = vld [vmem:[#allocation3 + $0x4] sm:$0xf]  ;;  %v2061_v26 = vor.u32 %v2710_v14, %v2058_v15 }
  0x29   :  { %322 = vmatpush.bf16.msra.mxu1 %v2073_v57  ;;  %335 = vmatpush.bf16.msra.mxu2 %v2013_v58  ;;  %v2709_v20 = vld [vmem:[#allocation3 + $0x84] sm:$0xf0]  ;;  %v1986_v24 = vld [vmem:[#allocation3 + $0x8] sm:$0xf0]  ;;  %s3357_s23 = sld [smem:[#allocation13_spill]]  ;;  %v1985_v32 = vor.u32 %v2693_v18, %v1984_v16  ;;  %s2939_s24 = smov 64  }
  0x2a   :  { %348 = vmatpush.bf16.msra.mxu3 %v2077_v62  ;;  %v2708_v27 = vld [vmem:[#allocation3 + $0x84] sm:$0xf]  ;;  %v2050_v28 = vld [vmem:[#allocation3 + $0x88] sm:$0xf0]  ;;  %v2168_v29 = vld [vmem:[#allocation3 + $0x70] sm:$0xf]  ;;  %v2049_v36 = vor.u32 %v2709_v20, %v2048_v19  ;;  %v1989_v37 = vor.u32 %v2692_v23, %v1986_v24 }
  0x2b   :  { %v2739_v30 = vld [vmem:[#allocation3 + $0x74] sm:$0xf0]  ;;  %v2232_v31 = vld [vmem:[#allocation3 + $0xf0] sm:$0xf]  ;;  %v2738_v34 = vld [vmem:[#allocation3 + $0x74] sm:$0xf]  ;;  %v2053_v40 = vor.u32 %v2708_v27, %v2050_v28 }
  0x2c   :  { %310 = vmatpush.bf16.msra.mxu0 %v2001_v4  ;;  %v2755_v33 = vld [vmem:[#allocation3 + $0xf4] sm:$0xf0]  ;;  %v2170_v35 = vld [vmem:[#allocation3 + $0x78] sm:$0xf0]  ;;  %v2754_v38 = vld [vmem:[#allocation3 + $0xf4] sm:$0xf]  ;;  %v2169_v41 = vor.u32 %v2739_v30, %v2168_v29 }
  0x2d   :  { %323 = vmatpush.bf16.msra.mxu1 %v2065_v5  ;;  %336 = vmatpush.bf16.msra.mxu2 %v2005_v6  ;;  %v2234_v39 = vld [vmem:[#allocation3 + $0xf8] sm:$0xf0]  ;;  %v2160_v42 = vld [vmem:[#allocation3 + $0x60] sm:$0xf]  ;;  %v2233_v43 = vor.u32 %v2755_v33, %v2232_v31  ;;  %v2173_v44 = vor.u32 %v2738_v34, %v2170_v35  ;;  %v2737_v45 = vld [vmem:[#allocation3 + $0x64] sm:$0xf0] }
  0x2e   :  { %349 = vmatpush.bf16.msra.mxu3 %v2069_v10  ;;  %v2224_v46 = vld [vmem:[#allocation3 + $0xe0] sm:$0xf]  ;;  %v2753_v47 = vld [vmem:[#allocation3 + $0xe4] sm:$0xf0]  ;;  %v2237_v48 = vor.u32 %v2754_v38, %v2234_v39  ;;  %v2736_v49 = vld [vmem:[#allocation3 + $0x64] sm:$0xf]  ;;  %v2161_v55 = vor.u32 %v2737_v45, %v2160_v42 }
  0x2f   :  { %v3044_v25 = vld [vmem:[%s3357_s23] sm:$0xff]  ;;  %v2162_v50 = vld [vmem:[#allocation3 + $0x68] sm:$0xf0]  ;;  %v2752_v51 = vld [vmem:[#allocation3 + $0xe4] sm:$0xf]  ;;  %v2225_v56 = vor.u32 %v2753_v47, %v2224_v46  ;;  %vm368_vm0 = vcmask 517120  }
  0x30   :  { %140 = vst [vmem:[#allocation1] ss:$9 sm:$0xff] %v3044_v25  ;;  %311 = vmatpush.bf16.msra.mxu0 %v1993_v17  ;;  %v2226_v54 = vld [vmem:[#allocation3 + $0xe8] sm:$0xf0]  ;;  %v2165_v57 = vor.u32 %v2736_v49, %v2162_v50  ;;  %v2152_v58 = vld [vmem:[#allocation3 + $0x50] sm:$0xf] }
  0x31   :  { %324 = vmatpush.bf16.msra.mxu1 %v2057_v21  ;;  %337 = vmatpush.bf16.msra.mxu2 %v1997_v22  ;;  %v2735_v59 = vld [vmem:[#allocation3 + $0x54] sm:$0xf0]  ;;  %v2216_v60 = vld [vmem:[#allocation3 + $0xd0] sm:$0xf]  ;;  %v2229_v61 = vor.u32 %v2752_v51, %v2226_v54  ;;  %v2734_v63 = vld [vmem:[#allocation3 + $0x54] sm:$0xf] }
  0x32   :  { %350 = vmatpush.bf16.msra.mxu3 %v2061_v26  ;;  %v2751_v62 = vld [vmem:[#allocation3 + $0xd4] sm:$0xf0]  ;;  %v2154_v0 = vld [vmem:[#allocation3 + $0x58] sm:$0xf0]  ;;  %v2750_v1 = vld [vmem:[#allocation3 + $0xd4] sm:$0xf]  ;;  %v2153_v3 = vor.u32 %v2735_v59, %v2152_v58 }
  0x33   :  { %v2218_v2 = vld [vmem:[#allocation3 + $0xd8] sm:$0xf0]  ;;  %v2217_v4 = vor.u32 %v2751_v62, %v2216_v60  ;;  %v2157_v5 = vor.u32 %v2734_v63, %v2154_v0  ;;  %v2144_v6 = vld [vmem:[#allocation3 + $0x40] sm:$0xf]  ;;  %v2733_v7 = vld [vmem:[#allocation3 + $0x44] sm:$0xf0] }
  0x34   :  { %312 = vmatpush.bf16.msra.mxu0 %v1985_v32  ;;  %v2208_v8 = vld [vmem:[#allocation3 + $0xc0] sm:$0xf]  ;;  %v2221_v9 = vor.u32 %v2750_v1, %v2218_v2  ;;  %v2749_v10 = vld [vmem:[#allocation3 + $0xc4] sm:$0xf0]  ;;  %v2732_v11 = vld [vmem:[#allocation3 + $0x44] sm:$0xf]  ;;  %v2145_v15 = vor.u32 %v2733_v7, %v2144_v6 }
  0x35   :  { %325 = vmatpush.bf16.msra.mxu1 %v2049_v36  ;;  %338 = vmatpush.bf16.msra.mxu2 %v1989_v37  ;;  %v2146_v12 = vld [vmem:[#allocation3 + $0x48] sm:$0xf0]  ;;  %v2748_v13 = vld [vmem:[#allocation3 + $0xc4] sm:$0xf]  ;;  %v2209_v16 = vor.u32 %v2749_v10, %v2208_v8  ;;  %v2136_v18 = vld [vmem:[#allocation3 + $0x30] sm:$0xf] }
  0x36   :  { %351 = vmatpush.bf16.msra.mxu3 %v2053_v40  ;;  %v2210_v14 = vld [vmem:[#allocation3 + $0xc8] sm:$0xf0]  ;;  %v2149_v17 = vor.u32 %v2732_v11, %v2146_v12  ;;  %v2731_v19 = vld [vmem:[#allocation3 + $0x34] sm:$0xf0]  ;;  %v2200_v20 = vld [vmem:[#allocation3 + $0xb0] sm:$0xf] }
  0x37   :  { %v141_v52 = vld [vmem:[#allocation1] sm:$0xff]  ;;  %v142_v53 = vld [vmem:[#allocation1 + $0x9] sm:$0xff]  ;;  %v2213_v21 = vor.u32 %v2748_v13, %v2210_v14  ;;  %v2137_v28 = vor.u32 %v2731_v19, %v2136_v18  ;;  %v2729_v32 = vld [vmem:[#allocation3 + $0x24] sm:$0xf0]  ;;  %vm634_vm1 = vcmask 1041920   ;;  %s1712_s19 = sld [smem:[#allocation6]] }
  0x38   :  { %567 = vmatpush.bf16.msrb.mxu0 %v2169_v41  ;;  %402 = vst [vmem:[#allocation1] ss:$9 sm:$0xff] %v3044_v25  ;;  %326 = vmatmul.bf16.vlgmr.msra.gmra.mxu1 %v142_v53  ;;  %v2747_v22 = vld [vmem:[#allocation3 + $0xb4] sm:$0xf0]  ;;  %v2730_v23 = vld [vmem:[#allocation3 + $0x34] sm:$0xf] }
  0x39   :  { %580 = vmatpush.bf16.msrb.mxu1 %v2233_v43  ;;  %593 = vmatpush.bf16.msrb.mxu2 %v2173_v44  ;;  %v2138_v24 = vld [vmem:[#allocation3 + $0x38] sm:$0xf0]  ;;  %v2746_v26 = vld [vmem:[#allocation3 + $0xb4] sm:$0xf]  ;;  %v2128_v29 = vld [vmem:[#allocation3 + $0x20] sm:$0xf]  ;;  %v2201_v30 = vor.u32 %v2747_v22, %v2200_v20 }
  0x3a   :  { %606 = vmatpush.bf16.msrb.mxu3 %v2237_v48  ;;  %313 = vmatmul.bf16.vlgmr.msra.gmra.mxu0 %v141_v52  ;;  %v2202_v27 = vld [vmem:[#allocation3 + $0xb8] sm:$0xf0]  ;;  %v2141_v31 = vor.u32 %v2730_v23, %v2138_v24  ;;  %v2192_v33 = vld [vmem:[#allocation3 + $0xa0] sm:$0xf]  ;;  %v2745_v34 = vld [vmem:[#allocation3 + $0xa4] sm:$0xf0]  ;;  %v2129_v42 = vor.u32 %v2729_v32, %v2128_v29 }
  0x3b   :  { %339 = vmatmul.bf16.vlgmr.msra.gmra.mxu2 %v141_v52  ;;  %352 = vmatmul.bf16.vlgmr.msra.gmra.mxu3 %v142_v53  ;;  %v2205_v35 = vor.u32 %v2746_v26, %v2202_v27  ;;  %v2728_v36 = vld [vmem:[#allocation3 + $0x24] sm:$0xf]  ;;  %v2130_v37 = vld [vmem:[#allocation3 + $0x28] sm:$0xf0]  ;;  %v2193_v43 = vor.u32 %v2745_v34, %v2192_v33  ;;  %v2120_v45 = vld [vmem:[#allocation3 + $0x10] sm:$0xf] }
  0x3c   :  { %568 = vmatpush.bf16.msrb.mxu0 %v2161_v55  ;;  %v2744_v38 = vld [vmem:[#allocation3 + $0xa4] sm:$0xf]  ;;  %v2194_v39 = vld [vmem:[#allocation3 + $0xa8] sm:$0xf0]  ;;  %v2133_v44 = vor.u32 %v2728_v36, %v2130_v37  ;;  %v2727_v46 = vld [vmem:[#allocation3 + $0x14] sm:$0xf0] }
  0x3d   :  { %581 = vmatpush.bf16.msrb.mxu1 %v2225_v56  ;;  %594 = vmatpush.bf16.msrb.mxu2 %v2165_v57  ;;  %v2184_v47 = vld [vmem:[#allocation3 + $0x90] sm:$0xf]  ;;  %v2197_v48 = vor.u32 %v2744_v38, %v2194_v39  ;;  %v2743_v49 = vld [vmem:[#allocation3 + $0x94] sm:$0xf0]  ;;  %v2726_v50 = vld [vmem:[#allocation3 + $0x14] sm:$0xf]  ;;  %v2121_v54 = vor.u32 %v2727_v46, %v2120_v45 }
  0x3e   :  { %607 = vmatpush.bf16.msrb.mxu3 %v2229_v61  ;;  %v2122_v51 = vld [vmem:[#allocation3 + $0x18] sm:$0xf0]  ;;  %v2742_v52 = vld [vmem:[#allocation3 + $0x94] sm:$0xf]  ;;  %v2112_v55 = vld [vmem:[#allocation3] sm:$0xf]  ;;  %v2185_v57 = vor.u32 %v2743_v49, %v2184_v47 }
  0x3f   :  { %v3048_v40 = vld [vmem:[#allocation1 + $0x12] sm:$0xff]  ;;  %v3050_v41 = vld [vmem:[#allocation1 + $0x1b] sm:$0xff]  ;;  %v2186_v53 = vld [vmem:[#allocation3 + $0x98] sm:$0xf0]  ;;  %v2125_v58 = vor.u32 %v2726_v50, %v2122_v51  ;;  %s1711_s1 = sld [smem:[#allocation7]]  ;;  %vm1361_vm2 = vcmask 523264  }
  0x40   :  { %569 = vmatpush.bf16.msrb.mxu0 %v2153_v3  ;;  %668 = vst [vmem:[#allocation1] ss:$9 sm:$0xff] %v3044_v25  ;;  %v2725_v56 = vld [vmem:[#allocation3 + $0x4] sm:$0xf0]  ;;  %v2176_v59 = vld [vmem:[#allocation3 + $0x80] sm:$0xf]  ;;  %v2189_v62 = vor.u32 %v2742_v52, %v2186_v53 }
  0x41   :  { %582 = vmatpush.bf16.msrb.mxu1 %v2217_v4  ;;  %595 = vmatpush.bf16.msrb.mxu2 %v2157_v5  ;;  %v2741_v60 = vld [vmem:[#allocation3 + $0x84] sm:$0xf0]  ;;  %v2724_v61 = vld [vmem:[#allocation3 + $0x4] sm:$0xf]  ;;  %v2114_v63 = vld [vmem:[#allocation3 + $0x8] sm:$0xf0]  ;;  %v2113_v5 = vor.u32 %v2725_v56, %v2112_v55 }
  0x42   :  { %608 = vmatpush.bf16.msrb.mxu3 %v2221_v9  ;;  %v2740_v0 = vld [vmem:[#allocation3 + $0x84] sm:$0xf]  ;;  %v2178_v1 = vld [vmem:[#allocation3 + $0x88] sm:$0xf0]  ;;  %v2296_v2 = vld [vmem:[#allocation3 + $0x70] sm:$0xf]  ;;  %v2177_v9 = vor.u32 %v2741_v60, %v2176_v59  ;;  %v2117_v10 = vor.u32 %v2724_v61, %v2114_v63 }
  0x43   :  { %v2771_v3 = vld [vmem:[#allocation3 + $0x74] sm:$0xf0]  ;;  %v2360_v4 = vld [vmem:[#allocation3 + $0xf0] sm:$0xf]  ;;  %v2770_v7 = vld [vmem:[#allocation3 + $0x74] sm:$0xf]  ;;  %v2181_v13 = vor.u32 %v2740_v0, %v2178_v1 }
  0x44   :  { %570 = vmatpush.bf16.msrb.mxu0 %v2145_v15  ;;  %v2787_v6 = vld [vmem:[#allocation3 + $0xf4] sm:$0xf0]  ;;  %v2298_v8 = vld [vmem:[#allocation3 + $0x78] sm:$0xf0]  ;;  %v2786_v11 = vld [vmem:[#allocation3 + $0xf4] sm:$0xf]  ;;  %v2297_v14 = vor.u32 %v2771_v3, %v2296_v2 }
  0x45   :  { %583 = vmatpush.bf16.msrb.mxu1 %v2209_v16  ;;  %596 = vmatpush.bf16.msrb.mxu2 %v2149_v17  ;;  %v2362_v12 = vld [vmem:[#allocation3 + $0xf8] sm:$0xf0]  ;;  %v2361_v15 = vor.u32 %v2787_v6, %v2360_v4  ;;  %v2301_v16 = vor.u32 %v2770_v7, %v2298_v8  ;;  %v2288_v17 = vld [vmem:[#allocation3 + $0x60] sm:$0xf]  ;;  %v2769_v18 = vld [vmem:[#allocation3 + $0x64] sm:$0xf0] }
  0x46   :  { %609 = vmatpush.bf16.msrb.mxu3 %v2213_v21  ;;  %v2352_v19 = vld [vmem:[#allocation3 + $0xe0] sm:$0xf]  ;;  %v2365_v20 = vor.u32 %v2786_v11, %v2362_v12  ;;  %v2785_v21 = vld [vmem:[#allocation3 + $0xe4] sm:$0xf0]  ;;  %v2768_v22 = vld [vmem:[#allocation3 + $0x64] sm:$0xf]  ;;  %v2289_v27 = vor.u32 %v2769_v18, %v2288_v17 }
  0x47   :  { %v2290_v23 = vld [vmem:[#allocation3 + $0x68] sm:$0xf0]  ;;  %v2784_v24 = vld [vmem:[#allocation3 + $0xe4] sm:$0xf]  ;;  %v2344_v32 = vld [vmem:[#allocation3 + $0xd0] sm:$0xf] }
  0x48   :  { %571 = vmatpush.bf16.msrb.mxu0 %v2137_v28  ;;  %v2354_v26 = vld [vmem:[#allocation3 + $0xe8] sm:$0xf0]  ;;  %v2353_v28 = vor.u32 %v2785_v21, %v2352_v19  ;;  %v2293_v29 = vor.u32 %v2768_v22, %v2290_v23  ;;  %v2783_v34 = vld [vmem:[#allocation3 + $0xd4] sm:$0xf0]  ;;  %v2282_v36 = vld [vmem:[#allocation3 + $0x58] sm:$0xf0] }
  0x49   :  { %584 = vmatpush.bf16.msrb.mxu1 %v2201_v30  ;;  %597 = vmatpush.bf16.msrb.mxu2 %v2141_v31  ;;  %v2280_v30 = vld [vmem:[#allocation3 + $0x50] sm:$0xf]  ;;  %v2767_v31 = vld [vmem:[#allocation3 + $0x54] sm:$0xf0]  ;;  %v2357_v33 = vor.u32 %v2784_v24, %v2354_v26  ;;  %v2782_v37 = vld [vmem:[#allocation3 + $0xd4] sm:$0xf] }
  0x4a   :  { %610 = vmatpush.bf16.msrb.mxu3 %v2205_v35  ;;  %v2766_v35 = vld [vmem:[#allocation3 + $0x54] sm:$0xf]  ;;  %v2346_v38 = vld [vmem:[#allocation3 + $0xd8] sm:$0xf0]  ;;  %v2281_v39 = vor.u32 %v2767_v31, %v2280_v30  ;;  %v2765_v45 = vld [vmem:[#allocation3 + $0x44] sm:$0xf0] }
  0x4b   :  { %v2336_v46 = vld [vmem:[#allocation3 + $0xc0] sm:$0xf]  ;;  %v2781_v47 = vld [vmem:[#allocation3 + $0xc4] sm:$0xf0]  ;;  %v2764_v49 = vld [vmem:[#allocation3 + $0x44] sm:$0xf] }
  0x4c   :  { %572 = vmatpush.bf16.msrb.mxu0 %v2129_v42  ;;  %v2272_v42 = vld [vmem:[#allocation3 + $0x40] sm:$0xf]  ;;  %v2274_v50 = vld [vmem:[#allocation3 + $0x48] sm:$0xf0]  ;;  %v2780_v51 = vld [vmem:[#allocation3 + $0xc4] sm:$0xf] }
  0x4d   :  { %585 = vmatpush.bf16.msrb.mxu1 %v2193_v43  ;;  %598 = vmatpush.bf16.msrb.mxu2 %v2133_v44  ;;  %v2345_v43 = vor.u32 %v2783_v34, %v2344_v32  ;;  %v2285_v44 = vor.u32 %v2766_v35, %v2282_v36  ;;  %v3057_v52 = vld [vmem:[#allocation1 + $0x24] sm:$0xff]  ;;  %v3059_v53 = vld [vmem:[#allocation1 + $0x2d] sm:$0xff]  ;;  %v2277_v55 = vor.u32 %v2764_v49, %v2274_v50  ;;  %v2264_v56 = vld [vmem:[#allocation3 + $0x30] sm:$0xf]  ;;  %s2654_s13 = sld [smem:[#allocation6 + $0x1]]  ;;  %s2940_s17 = smov 112  }
  0x4e   :  { %611 = vmatpush.bf16.msrb.mxu3 %v2197_v48  ;;  %v2349_v48 = vor.u32 %v2782_v37, %v2346_v38  ;;  %929 = vst [vmem:[#allocation1] ss:$9 sm:$0xff] %v3044_v25  ;;  %v2779_v60 = vld [vmem:[#allocation3 + $0xb4] sm:$0xf0]  ;;  %v2762_v61 = vld [vmem:[#allocation3 + $0x34] sm:$0xf] }
  0x4f   :  { %v2778_v63 = vld [vmem:[#allocation3 + $0xb4] sm:$0xf]  ;;  %v2330_v0 = vld [vmem:[#allocation3 + $0xb8] sm:$0xf0]  ;;  %v2256_v4 = vld [vmem:[#allocation3 + $0x20] sm:$0xf] }
  0x50   :  { %573 = vmatpush.bf16.msrb.mxu0 %v2121_v54  ;;  %v2337_v54 = vor.u32 %v2781_v47, %v2336_v46  ;;  %v2320_v6 = vld [vmem:[#allocation3 + $0xa0] sm:$0xf]  ;;  %v2333_v7 = vor.u32 %v2778_v63, %v2330_v0  ;;  %v2777_v8 = vld [vmem:[#allocation3 + $0xa4] sm:$0xf0]  ;;  %v2776_v11 = vld [vmem:[#allocation3 + $0xa4] sm:$0xf] }
  0x51   :  { %586 = vmatpush.bf16.msrb.mxu1 %v2185_v57  ;;  %599 = vmatpush.bf16.msrb.mxu2 %v2125_v58  ;;  %v2763_v57 = vld [vmem:[#allocation3 + $0x34] sm:$0xf0]  ;;  %v2328_v58 = vld [vmem:[#allocation3 + $0xb0] sm:$0xf]  ;;  %v2322_v12 = vld [vmem:[#allocation3 + $0xa8] sm:$0xf0] }
  0x52   :  { %612 = vmatpush.bf16.msrb.mxu3 %v2189_v62  ;;  %v2266_v62 = vld [vmem:[#allocation3 + $0x38] sm:$0xf0]  ;;  %v2265_v1 = vor.u32 %v2763_v57, %v2264_v56  ;;  %v2329_v2 = vor.u32 %v2779_v60, %v2328_v58  ;;  %v2759_v17 = vld [vmem:[#allocation3 + $0x14] sm:$0xf0]  ;;  %v2312_v18 = vld [vmem:[#allocation3 + $0x90] sm:$0xf]  ;;  %v2325_v19 = vor.u32 %v2776_v11, %v2322_v12 }
  0x53   :  { %v2269_v3 = vor.u32 %v2762_v61, %v2266_v62  ;;  %v2758_v21 = vld [vmem:[#allocation3 + $0x14] sm:$0xf]  ;;  %v2250_v22 = vld [vmem:[#allocation3 + $0x18] sm:$0xf0]  ;;  %v2304_v31 = vld [vmem:[#allocation3 + $0x80] sm:$0xf] }
  0x54   :  { %574 = vmatpush.bf16.msrb.mxu0 %v2113_v5  ;;  %v2761_v5 = vld [vmem:[#allocation3 + $0x24] sm:$0xf0]  ;;  %v2774_v23 = vld [vmem:[#allocation3 + $0x94] sm:$0xf]  ;;  %v2314_v24 = vld [vmem:[#allocation3 + $0x98] sm:$0xf0]  ;;  %v2253_v30 = vor.u32 %v2758_v21, %v2250_v22 }
  0x55   :  { %587 = vmatpush.bf16.msrb.mxu1 %v2177_v9  ;;  %600 = vmatpush.bf16.msrb.mxu2 %v2117_v10  ;;  %v2760_v9 = vld [vmem:[#allocation3 + $0x24] sm:$0xf]  ;;  %v2258_v10 = vld [vmem:[#allocation3 + $0x28] sm:$0xf0]  ;;  %v2773_v32 = vld [vmem:[#allocation3 + $0x84] sm:$0xf0]  ;;  %v2317_v34 = vor.u32 %v2774_v23, %v2314_v24 }
  0x56   :  { %613 = vmatpush.bf16.msrb.mxu3 %v2181_v13  ;;  %v2257_v13 = vor.u32 %v2761_v5, %v2256_v4  ;;  %v2242_v35 = vld [vmem:[#allocation3 + $0x8] sm:$0xf0]  ;;  %v2772_v36 = vld [vmem:[#allocation3 + $0x84] sm:$0xf]  ;;  %v2424_v38 = vld [vmem:[#allocation3 + $0x70] sm:$0xf]  ;;  %v2305_v47 = vor.u32 %v2773_v32, %v2304_v31 }
  0x57   :  { %575 = vmatmul.bf16.vlgmr.msrb.gmra.mxu0 %v3048_v40  ;;  %v2306_v37 = vld [vmem:[#allocation3 + $0x88] sm:$0xf0]  ;;  %v2426_v46 = vld [vmem:[#allocation3 + $0x78] sm:$0xf0]  ;;  %v2818_v49 = vld [vmem:[#allocation3 + $0xf4] sm:$0xf] }
  0x58   :  { %833 = vmatpush.bf16.msra.mxu0 %v2297_v14  ;;  %588 = vmatmul.bf16.vlgmr.msrb.gmra.mxu1 %v3050_v41  ;;  %v2321_v14 = vor.u32 %v2777_v8, %v2320_v6  ;;  %v2490_v50 = vld [vmem:[#allocation3 + $0xf8] sm:$0xf0]  ;;  %v2801_v56 = vld [vmem:[#allocation3 + $0x64] sm:$0xf0]  ;;  %v2480_v57 = vld [vmem:[#allocation3 + $0xe0] sm:$0xf] }
  0x59   :  { %846 = vmatpush.bf16.msra.mxu1 %v2361_v15  ;;  %859 = vmatpush.bf16.msra.mxu2 %v2301_v16  ;;  %v2261_v15 = vor.u32 %v2760_v9, %v2258_v10  ;;  %v2248_v16 = vld [vmem:[#allocation3 + $0x10] sm:$0xf]  ;;  %v2493_v58 = vor.u32 %v2818_v49, %v2490_v50  ;;  %v2800_v60 = vld [vmem:[#allocation3 + $0x64] sm:$0xf]  ;;  %v2418_v61 = vld [vmem:[#allocation3 + $0x68] sm:$0xf0] }
  0x5a   :  { %872 = vmatpush.bf16.msra.mxu3 %v2365_v20  ;;  %601 = vmatmul.bf16.vlgmr.msrb.gmra.mxu2 %v3048_v40  ;;  %v2338_v40 = vld [vmem:[#allocation3 + $0xc8] sm:$0xf0]  ;;  %v2775_v20 = vld [vmem:[#allocation3 + $0x94] sm:$0xf0]  ;;  %v2249_v26 = vor.u32 %v2759_v17, %v2248_v16  ;;  %v2816_v62 = vld [vmem:[#allocation3 + $0xe4] sm:$0xf] }
  0x5b   :  { %614 = vmatmul.bf16.vlgmr.msrb.gmra.mxu3 %v3050_v41  ;;  %v2273_v41 = vor.u32 %v2765_v45, %v2272_v42  ;;  %v2341_v59 = vor.u32 %v2780_v51, %v2338_v40  ;;  %v2488_v42 = vld [vmem:[#allocation3 + $0xf0] sm:$0xf]  ;;  %v2802_v45 = vld [vmem:[#allocation3 + $0x74] sm:$0xf]  ;;  %v2309_v51 = vor.u32 %v2772_v36, %v2306_v37  ;;  %v2482_v63 = vld [vmem:[#allocation3 + $0xe8] sm:$0xf0] }
  0x5c   :  { %834 = vmatpush.bf16.msra.mxu0 %v2289_v27  ;;  %v2240_v27 = vld [vmem:[#allocation3] sm:$0xf]  ;;  %v2799_v4 = vld [vmem:[#allocation3 + $0x54] sm:$0xf0]  ;;  %v2472_v5 = vld [vmem:[#allocation3 + $0xd0] sm:$0xf]  ;;  %v2485_v6 = vor.u32 %v2816_v62, %v2482_v63 }
  0x5d   :  { %847 = vmatpush.bf16.msra.mxu1 %v2353_v28  ;;  %860 = vmatpush.bf16.msra.mxu2 %v2293_v29  ;;  %v2757_v28 = vld [vmem:[#allocation3 + $0x4] sm:$0xf0]  ;;  %v2313_v29 = vor.u32 %v2775_v20, %v2312_v18  ;;  %v2798_v8 = vld [vmem:[#allocation3 + $0x54] sm:$0xf]  ;;  %v2410_v9 = vld [vmem:[#allocation3 + $0x58] sm:$0xf0] }
  0x5e   :  { %873 = vmatpush.bf16.msra.mxu3 %v2357_v33  ;;  %v2756_v33 = vld [vmem:[#allocation3 + $0x4] sm:$0xf]  ;;  %v2814_v10 = vld [vmem:[#allocation3 + $0xd4] sm:$0xf]  ;;  %v2474_v11 = vld [vmem:[#allocation3 + $0xd8] sm:$0xf0] }
  0x5f   :  { %v2797_v16 = vld [vmem:[#allocation3 + $0x44] sm:$0xf0]  ;;  %v2464_v17 = vld [vmem:[#allocation3 + $0xc0] sm:$0xf]  ;;  %v2477_v18 = vor.u32 %v2814_v10, %v2474_v11  ;;  %v2796_v20 = vld [vmem:[#allocation3 + $0x44] sm:$0xf] }
  0x60   :  { %835 = vmatpush.bf16.msra.mxu0 %v2281_v39  ;;  %v2803_v39 = vld [vmem:[#allocation3 + $0x74] sm:$0xf0]  ;;  %v2402_v21 = vld [vmem:[#allocation3 + $0x48] sm:$0xf0]  ;;  %v2812_v22 = vld [vmem:[#allocation3 + $0xc4] sm:$0xf] }
  0x61   :  { %848 = vmatpush.bf16.msra.mxu1 %v2345_v43  ;;  %861 = vmatpush.bf16.msra.mxu2 %v2285_v44  ;;  %v2241_v43 = vor.u32 %v2757_v28, %v2240_v27  ;;  %v2819_v44 = vld [vmem:[#allocation3 + $0xf4] sm:$0xf0]  ;;  %v2425_v40 = vor.u32 %v2803_v39, %v2424_v38  ;;  %v2466_v23 = vld [vmem:[#allocation3 + $0xc8] sm:$0xf0]  ;;  %v2456_v28 = vld [vmem:[#allocation3 + $0xb0] sm:$0xf] }
  0x62   :  { %874 = vmatpush.bf16.msra.mxu3 %v2349_v48  ;;  %v2245_v48 = vor.u32 %v2756_v33, %v2242_v35  ;;  %v2795_v27 = vld [vmem:[#allocation3 + $0x34] sm:$0xf0]  ;;  %v2794_v31 = vld [vmem:[#allocation3 + $0x34] sm:$0xf]  ;;  %v2394_v32 = vld [vmem:[#allocation3 + $0x38] sm:$0xf0] }
  0x63   :  { %v2810_v33 = vld [vmem:[#allocation3 + $0xb4] sm:$0xf]  ;;  %v2397_v37 = vor.u32 %v2794_v31, %v2394_v32  ;;  %v2384_v38 = vld [vmem:[#allocation3 + $0x20] sm:$0xf]  ;;  %v2793_v39 = vld [vmem:[#allocation3 + $0x24] sm:$0xf0] }
  0x64   :  { %836 = vmatpush.bf16.msra.mxu0 %v2273_v41  ;;  %v2489_v41 = vor.u32 %v2819_v44, %v2488_v42  ;;  %v2448_v42 = vld [vmem:[#allocation3 + $0xa0] sm:$0xf]  ;;  %v2809_v44 = vld [vmem:[#allocation3 + $0xa4] sm:$0xf0]  ;;  %v2385_v49 = vor.u32 %v2793_v39, %v2384_v38  ;;  %s2656_s26 = sld [smem:[#allocation6 + $0x3]]  ;;  %vm1399_vm3 = vcmask 130048  }
  0x65   :  { %849 = vmatpush.bf16.msra.mxu1 %v2337_v54  ;;  %862 = vmatpush.bf16.msra.mxu2 %v2277_v55  ;;  %v2429_v54 = vor.u32 %v2802_v45, %v2426_v46  ;;  %v2416_v55 = vld [vmem:[#allocation3 + $0x60] sm:$0xf]  ;;  %v2792_v45 = vld [vmem:[#allocation3 + $0x24] sm:$0xf]  ;;  %v2386_v46 = vld [vmem:[#allocation3 + $0x28] sm:$0xf0]  ;;  %v2449_v50 = vor.u32 %v2809_v44, %v2448_v42 }
  0x66   :  { %875 = vmatpush.bf16.msra.mxu3 %v2341_v59  ;;  %v2817_v59 = vld [vmem:[#allocation3 + $0xe4] sm:$0xf0]  ;;  %v2417_v0 = vor.u32 %v2801_v56, %v2416_v55  ;;  %v2807_v56 = vld [vmem:[#allocation3 + $0x94] sm:$0xf0]  ;;  %s1203_s0 = sld [smem:[#allocation9]]  ;;  %vm1460_vm4 = vcmask 1041408  }
  0x67   :  { %vm1456_vm5 = vcmask 31744   ;;  %s2586_s29 = sld [smem:[#allocation9 + $0x2]] }
  0x68   :  { %837 = vmatpush.bf16.msra.mxu0 %v2265_v1  ;;  %v2481_v1 = vor.u32 %v2817_v59, %v2480_v57  ;;  %v2790_v57 = vld [vmem:[#allocation3 + $0x14] sm:$0xf]  ;;  %s2591_s30 = sld [smem:[#allocation9 + $0x4]] }
  0x69   :  { %850 = vmatpush.bf16.msra.mxu1 %v2329_v2  ;;  %863 = vmatpush.bf16.msra.mxu2 %v2269_v3  ;;  %v2421_v2 = vor.u32 %v2800_v60, %v2418_v61  ;;  %v2408_v3 = vld [vmem:[#allocation3 + $0x50] sm:$0xf]  ;;  %v2806_v59 = vld [vmem:[#allocation3 + $0x94] sm:$0xf]  ;;  %v2442_v60 = vld [vmem:[#allocation3 + $0x98] sm:$0xf0] }
  0x6a   :  { %876 = vmatpush.bf16.msra.mxu3 %v2333_v7  ;;  %v2815_v7 = vld [vmem:[#allocation3 + $0xd4] sm:$0xf0]  ;;  %v2409_v12 = vor.u32 %v2799_v4, %v2408_v3  ;;  %v2445_v3 = vor.u32 %v2806_v59, %v2442_v60  ;;  %v2805_v4 = vld [vmem:[#allocation3 + $0x84] sm:$0xf0]  ;;  %s2658_s20 = sld [smem:[#allocation6 + $0x4]] }
  0x6b   :  { %s2657_s21 = sld [smem:[#allocation7 + $0x1]] }
  0x6c   :  { %838 = vmatpush.bf16.msra.mxu0 %v2257_v13  ;;  %v2473_v13 = vor.u32 %v2815_v7, %v2472_v5  ;;  %v2788_v5 = vld [vmem:[#allocation3 + $0x4] sm:$0xf]  ;;  %s2659_s22 = sld [smem:[#allocation6 + $0x5]] }
  0x6d   :  { %851 = vmatpush.bf16.msra.mxu1 %v2321_v14  ;;  %864 = vmatpush.bf16.msra.mxu2 %v2261_v15  ;;  %v2413_v14 = vor.u32 %v2798_v8, %v2410_v9  ;;  %v2400_v15 = vld [vmem:[#allocation3 + $0x40] sm:$0xf]  ;;  %v2804_v7 = vld [vmem:[#allocation3 + $0x84] sm:$0xf]  ;;  %v2434_v8 = vld [vmem:[#allocation3 + $0x88] sm:$0xf0] }
  0x6e   :  { %877 = vmatpush.bf16.msra.mxu3 %v2325_v19  ;;  %v2813_v19 = vld [vmem:[#allocation3 + $0xc4] sm:$0xf0]  ;;  %s2666_s15 = sld [smem:[#allocation6 + $0xb]] }
  0x6f   :  { %v2465_v24 = vor.u32 %v2813_v19, %v2464_v17  ;;  %s2668_s23 = sld [smem:[#allocation6 + $0xc]] }
  0x70   :  { %839 = vmatpush.bf16.msra.mxu0 %v2249_v26  ;;  %v2392_v26 = vld [vmem:[#allocation3 + $0x30] sm:$0xf]  ;;  %s2670_s25 = sld [smem:[#allocation6 + $0xe]] }
  0x71   :  { %852 = vmatpush.bf16.msra.mxu1 %v2313_v29  ;;  %865 = vmatpush.bf16.msra.mxu2 %v2253_v30  ;;  %v2469_v29 = vor.u32 %v2812_v22, %v2466_v23  ;;  %v2811_v30 = vld [vmem:[#allocation3 + $0xb4] sm:$0xf0]  ;;  %v2393_v35 = vor.u32 %v2795_v27, %v2392_v26  ;;  %s2674_s27 = sld [smem:[#allocation6 + $0x11]] }
  0x72   :  { %878 = vmatpush.bf16.msra.mxu3 %v2317_v34  ;;  %v2458_v34 = vld [vmem:[#allocation3 + $0xb8] sm:$0xf0]  ;;  %v2457_v36 = vor.u32 %v2811_v30, %v2456_v28  ;;  %s2675_s28 = sld [smem:[#allocation6 + $0x12]] }
  0x73   :  { %s2682_s18 = sld [smem:[#allocation7 + $0x6]] }
  0x74   :  { %840 = vmatpush.bf16.msra.mxu0 %v2241_v43  ;;  %v2461_v43 = vor.u32 %v2810_v33, %v2458_v34  ;;  %s2685_s14 = sld [smem:[#allocation6 + $0x1a]] }
  0x75   :  { %853 = vmatpush.bf16.msra.mxu1 %v2305_v47  ;;  %866 = vmatpush.bf16.msra.mxu2 %v2245_v48  ;;  %v2808_v47 = vld [vmem:[#allocation3 + $0xa4] sm:$0xf]  ;;  %v2450_v48 = vld [vmem:[#allocation3 + $0xa8] sm:$0xf0] }
  0x76   :  { %879 = vmatpush.bf16.msra.mxu3 %v2309_v51  ;;  %v2389_v51 = vor.u32 %v2792_v45, %v2386_v46  ;;  %v2453_v55 = vor.u32 %v2808_v47, %v2450_v48 }
  0x77   :  { %841 = vmatmul.bf16.vlgmr.msra.gmra.mxu0 %v3057_v52 }
  0x78   :  { %1094 = vmatpush.bf16.msrb.mxu0 %v2425_v40  ;;  %854 = vmatmul.bf16.vlgmr.msra.gmra.mxu1 %v3059_v53  ;;  %v2376_v40 = vld [vmem:[#allocation3 + $0x10] sm:$0xf] }
  0x79   :  { %1107 = vmatpush.bf16.msrb.mxu1 %v2489_v41  ;;  %1120 = vmatpush.bf16.msrb.mxu2 %v2429_v54  ;;  %v2791_v41 = vld [vmem:[#allocation3 + $0x14] sm:$0xf0]  ;;  %v2440_v54 = vld [vmem:[#allocation3 + $0x90] sm:$0xf] }
  0x7a   :  { %1133 = vmatpush.bf16.msrb.mxu3 %v2493_v58  ;;  %867 = vmatmul.bf16.vlgmr.msra.gmra.mxu2 %v3057_v52  ;;  %v2401_v52 = vor.u32 %v2797_v16, %v2400_v15  ;;  %v2378_v58 = vld [vmem:[#allocation3 + $0x18] sm:$0xf0]  ;;  %v2377_v61 = vor.u32 %v2791_v41, %v2376_v40  ;;  %v2441_v62 = vor.u32 %v2807_v56, %v2440_v54 }
  0x7b   :  { %880 = vmatmul.bf16.vlgmr.msra.gmra.mxu3 %v3059_v53  ;;  %v2405_v53 = vor.u32 %v2796_v20, %v2402_v21  ;;  %v2381_v63 = vor.u32 %v2790_v57, %v2378_v58 }
  0x7c   :  { %1095 = vmatpush.bf16.msrb.mxu0 %v2417_v0  ;;  %v2368_v0 = vld [vmem:[#allocation3] sm:$0xf] }
  0x7d   :  { %1108 = vmatpush.bf16.msrb.mxu1 %v2481_v1  ;;  %1121 = vmatpush.bf16.msrb.mxu2 %v2421_v2  ;;  %v2789_v1 = vld [vmem:[#allocation3 + $0x4] sm:$0xf0]  ;;  %v2432_v2 = vld [vmem:[#allocation3 + $0x80] sm:$0xf] }
  0x7e   :  { %1134 = vmatpush.bf16.msrb.mxu3 %v2485_v6  ;;  %v2370_v6 = vld [vmem:[#allocation3 + $0x8] sm:$0xf0]  ;;  %v2369_v9 = vor.u32 %v2789_v1, %v2368_v0  ;;  %v2433_v10 = vor.u32 %v2805_v4, %v2432_v2 }
  0x7f   :  { %v2373_v11 = vor.u32 %v2788_v5, %v2370_v6 }
  0x80   :  { %1096 = vmatpush.bf16.msrb.mxu0 %v2409_v12  ;;  %v2437_v12 = vor.u32 %v2804_v7, %v2434_v8  ;;  %v2827_v7 = vld [vmem:[%s3343_s4 + $0x38] sm:$0xff] }
  0x81   :  { %1109 = vmatpush.bf16.msrb.mxu1 %v2473_v13  ;;  %1122 = vmatpush.bf16.msrb.mxu2 %v2413_v14  ;;  %v930_v13 = vld [vmem:[#allocation1 + $0x36] sm:$0xff]  ;;  %v931_v14 = vld [vmem:[#allocation1 + $0x3f] sm:$0xff] }
  0x82   :  { %1135 = vmatpush.bf16.msrb.mxu3 %v2477_v18  ;;  %v2835_v8 = vld [vmem:[%s3343_s4 + $0x78] sm:$0xff] }
  0x84   :  { %1097 = vmatpush.bf16.msrb.mxu0 %v2401_v52 }
  0x85   :  { %1110 = vmatpush.bf16.msrb.mxu1 %v2465_v24  ;;  %1123 = vmatpush.bf16.msrb.mxu2 %v2405_v53 }
  0x86   :  { %1136 = vmatpush.bf16.msrb.mxu3 %v2469_v29 }
  0x88   :  { %1098 = vmatpush.bf16.msrb.mxu0 %v2393_v35 }
  0x89   :  { %1111 = vmatpush.bf16.msrb.mxu1 %v2457_v36  ;;  %1124 = vmatpush.bf16.msrb.mxu2 %v2397_v37 }
  0x8a   :  { %1137 = vmatpush.bf16.msrb.mxu3 %v2461_v43 }
  0x8c   :  { %1099 = vmatpush.bf16.msrb.mxu0 %v2385_v49 }
  0x8d   :  { %1112 = vmatpush.bf16.msrb.mxu1 %v2449_v50  ;;  %1125 = vmatpush.bf16.msrb.mxu2 %v2389_v51 }
  0x8e   :  { %1138 = vmatpush.bf16.msrb.mxu3 %v2453_v55 }
  0x90   :  { %1100 = vmatpush.bf16.msrb.mxu0 %v2377_v61 }
  0x91   :  { %1113 = vmatpush.bf16.msrb.mxu1 %v2441_v62  ;;  %1126 = vmatpush.bf16.msrb.mxu2 %v2381_v63 }
  0x92   :  { %1139 = vmatpush.bf16.msrb.mxu3 %v2445_v3 }
  0x94   :  { %1101 = vmatpush.bf16.msrb.mxu0 %v2369_v9 }
  0x95   :  { %1114 = vmatpush.bf16.msrb.mxu1 %v2433_v10  ;;  %1127 = vmatpush.bf16.msrb.mxu2 %v2373_v11  ;;  %v2826_v10 = vld [vmem:[%s3343_s4 + $0x30] sm:$0xff] }
  0x96   :  { %1140 = vmatpush.bf16.msrb.mxu3 %v2437_v12  ;;  %v2834_v11 = vld [vmem:[%s3343_s4 + $0x70] sm:$0xff] }
  0x97   :  { %1102 = vmatmul.bf16.vlgmr.msrb.gmra.mxu0 %v930_v13 }
  0x98   :  { %1115 = vmatmul.bf16.vlgmr.msrb.gmra.mxu1 %v931_v14  ;;  %1128 = vmatmul.bf16.vlgmr.msrb.gmra.mxu2 %v930_v13 }
  0x99   :  { %1141 = vmatmul.bf16.vlgmr.msrb.gmra.mxu3 %v931_v14  ;;  %1301 = vmatpush.bf16.msra.mxu0 %v2827_v7  ;;  %v2840_v7 = vld [vmem:[%s3344_s5] sm:$0xff]  ;;  %s2575_s5 = sld [smem:[#allocation9 + $0x1]] }
  0x9a   :  { %1314 = vmatpush.bf16.msra.mxu1 %v2835_v8  ;;  %1410 = vmatpush.bf16.msra.mxu3 %v2840_v7  ;;  %v2850_v7 = vld [vmem:[%s3351_s12 + $0x14] sm:$0xf] }
  0x9d   :  { %1302 = vmatpush.bf16.msra.mxu0 %v2826_v10  ;;  %v2841_v10 = vld [vmem:[%s3342_s3] sm:$0xff]  ;;  %s2942_s3 = smov 124  }
  0x9e   :  { %1315 = vmatpush.bf16.msra.mxu1 %v2834_v11 }
  0xb5   :  { %v327_v16 = vpop.f32.mrf.mxu1 }
  0xb7   :  { %v314_v15 = vpop.f32.mrf.mxu0 }
  0xb8   :  { %v328_v17 = vadd.f32 %v327_v16, %v314_v15  ;;  %v2825_v16 = vld [vmem:[%s3343_s4 + $0x28] sm:$0xff] }
  0xb9   :  { %1303 = vmatpush.bf16.msra.mxu0 %v2825_v16 }
  0xba   :  { %358 = vrot.lane.b32.xlu2 %v328_v17, %s2939_s24 }
  0xbd   :  { %v329_v22 = vpop.f32.mrf.mxu1 }
  0xbe   :  { %v340_v18 = vpop.f32.mrf.mxu2  ;;  %v353_v19 = vpop.f32.mrf.mxu3  ;;  %v2831_v22 = vld [vmem:[%s3343_s4 + $0x58] sm:$0xff] }
  0xbf   :  { %v316_v20 = vpop.f32.mrf.mxu0  ;;  %v354_v21 = vadd.f32 %v353_v19, %v340_v18  ;;  %v2824_v18 = vld [vmem:[%s3343_s4 + $0x20] sm:$0xff] }
  0xc0   :  { %v2832_v19 = vld [vmem:[%s3343_s4 + $0x60] sm:$0xff]  ;;  %1304 = vmatpush.bf16.msra.mxu0 %v2824_v18 }
  0xc2   :  { %363 = vrot.lane.b32.xlu2 %v354_v21, %s2939_s24 }
  0xc6   :  { %v342_v23 = vpop.f32.mrf.mxu2  ;;  %v355_v52 = vpop.f32.mrf.mxu3 }
  0xc7   :  { %v2822_v23 = vld [vmem:[%s3343_s4 + $0x10] sm:$0xff] }
  0xc8   :  { %v2830_v52 = vld [vmem:[%s3343_s4 + $0x50] sm:$0xff] }
  0xd4   :  { %v576_v24 = vpop.f32.mrf.mxu0 }
  0xd5   :  { %v589_v53 = vpop.f32.mrf.mxu1 }
  0xd6   :  { %v590_v26 = vadd.f32 %v589_v53, %v576_v24  ;;  %v2821_v24 = vld [vmem:[%s3343_s4 + $0x8] sm:$0xff] }
  0xd7   :  { %v2829_v53 = vld [vmem:[%s3343_s4 + $0x48] sm:$0xff] }
  0xd8   :  { %620 = vrot.lane.b32.xlu0 %v590_v26, %s2939_s24 }
  0xdc   :  { %v578_v29 = vpop.f32.mrf.mxu0 }
  0xdd   :  { %v602_v27 = vpop.f32.mrf.mxu2  ;;  %v591_v31 = vpop.f32.mrf.mxu1  ;;  %v3131_v29 = vunpack.c.l.bf16 %v3044_v25 }
  0xde   :  { %v615_v28 = vpop.f32.mrf.mxu3  ;;  %v2838_v31 = vld [vmem:[%s3341_s2 + $0x10] sm:$0xff] }
  0xdf   :  { %v616_v30 = vadd.f32 %v615_v28, %v602_v27  ;;  %v2828_v27 = vld [vmem:[%s3343_s4 + $0x40] sm:$0xff]  ;;  %v2839_v28 = vld [vmem:[%s3341_s2 + $0x18] sm:$0xff] }
  0xe0   :  { %1369 = vmatpush.bf16.msra.mxu2 %v2839_v28  ;;  %v1479_v28 = vld [vmem:[%s3346_s7] sm:$0x3]  ;;  %s2673_s7 = sld [smem:[#allocation6 + $0x10]] }
  0xe1   :  { %625 = vrot.lane.b32.xlu0 %v616_v30, %s2939_s24 }
  0xe4   :  { %1370 = vmatpush.bf16.msra.mxu2 %v2838_v31 }
  0xe5   :  { %v604_v32 = vpop.f32.mrf.mxu2 }
  0xe6   :  { %v617_v33 = vpop.f32.mrf.mxu3  ;;  %v1713_v32 = vstv %s1712_s19  ;;  %s2941_s19 = smov 96  }
  0xf4   :  { %v842_v34 = vpop.f32.mrf.mxu0 }
  0xf5   :  { %v855_v35 = vpop.f32.mrf.mxu1 }
  0xf6   :  { %v856_v36 = vadd.f32 %v855_v35, %v842_v34  ;;  %v1705_v34 = vrot.slane %v3044_v25, 4  ;;  %v1714_v35 = vmul.f32 %v1713_v32, %v3131_v29 }
  0xf8   :  { %886 = vrot.lane.b32.xlu0 %v856_v36, %s2939_s24 }
  0xfc   :  { %v844_v38 = vpop.f32.mrf.mxu0 }
  0xfd   :  { %v868_v37 = vpop.f32.mrf.mxu2  ;;  %v857_v42 = vpop.f32.mrf.mxu1  ;;  %v3141_v38 = vunpack.c.l.bf16 %v1705_v34 }
  0xfe   :  { %v881_v39 = vpop.f32.mrf.mxu3 }
  0xff   :  { %v882_v60 = vadd.f32 %v881_v39, %v868_v37  ;;  %v1718_v37 = vstv %s2654_s13  ;;  %v1708_v39 = vrot.slane %v3044_v25, 6  ;;  %s2943_s13 = smov 120  }
 0x105   :  { %v870_v43 = vpop.f32.mrf.mxu2 }
 0x106   :  { %v883_v44 = vpop.f32.mrf.mxu3 }
 0x114   :  { %v1103_v45 = vpop.f32.mrf.mxu0  ;;  %v359_v48 = vpop.permute.xlu2 %358 }
 0x115   :  { %v1116_v46 = vpop.f32.mrf.mxu1  ;;  %v361_v55 = vmax.f32 %v328_v17, %v359_v48  ;;  %v2833_v17 = vld [vmem:[%s3343_s4 + $0x68] sm:$0xff] }
 0x116   :  { %v1117_v47 = vadd.f32 %v1116_v46, %v1103_v45  ;;  %1316 = vmatpush.bf16.msra.mxu1 %v2833_v17  ;;  %v3145_v46 = vunpack.c.l.bf16 %v1708_v39  ;;  %v2844_v39 = vld [vmem:[%s3348_s9] sm:$0xff] }
 0x118   :  { %1147 = vrot.lane.b32.xlu1 %v1117_v47, %s2939_s24 }
 0x11a   :  { %1317 = vmatpush.bf16.msra.mxu1 %v2832_v19 }
 0x11b   :  { %v1129_v49 = vpop.f32.mrf.mxu2 }
 0x11c   :  { %v1142_v50 = vpop.f32.mrf.mxu3  ;;  %v1105_v51 = vpop.f32.mrf.mxu0 }
 0x11d   :  { %v1143_v40 = vadd.f32 %v1142_v50, %v1129_v49  ;;  %v1118_v41 = vpop.f32.mrf.mxu1  ;;  %v364_v54 = vpop.permute.xlu2 %363  ;;  %v1726_v49 = vstv %s2656_s26  ;;  %s2672_s26 = sld [smem:[#allocation7 + $0x4]] }
 0x11e   :  { %v366_v56 = vmax.f32 %v354_v21, %v364_v54  ;;  %v2823_v21 = vld [vmem:[%s3343_s4 + $0x18] sm:$0xff]  ;;  %1318 = vmatpush.bf16.msra.mxu1 %v2831_v22  ;;  %v1727_v51 = vmul.f32 %v1726_v49, %v3145_v46 }
 0x11f   :  { %1305 = vmatpush.bf16.msra.mxu0 %v2823_v21 }
 0x120   :  { %1152 = vrot.lane.b32.xlu1 %v1143_v40, %s2939_s24  ;;  %v367_v59 = vmax.f32 %v361_v55, %v366_v56 }
 0x122   :  { %369 = vst.msk [vmem:[#allocation2] sm:$0x3] %vm368_vm0, %v367_v59  ;;  %1319 = vmatpush.bf16.msra.mxu1 %v2830_v52  ;;  %v2836_v59 = vld [vmem:[%s3341_s2] sm:$0xff] }
 0x123   :  { %v1131_v57 = vpop.f32.mrf.mxu2  ;;  %1306 = vmatpush.bf16.msra.mxu0 %v2822_v23 }
 0x124   :  { %v1144_v58 = vpop.f32.mrf.mxu3 }
 0x125   :  { %v2837_v58 = vld [vmem:[%s3341_s2 + $0x8] sm:$0xff]  ;;  %s2681_s2 = sld [smem:[#allocation6 + $0x17]] }
 0x126   :  { %1320 = vmatpush.bf16.msra.mxu1 %v2829_v53  ;;  %1371 = vmatpush.bf16.msra.mxu2 %v2837_v58 }
 0x127   :  { %1307 = vmatpush.bf16.msra.mxu0 %v2821_v24  ;;  %v1453_v24 = vld [vmem:[%s3345_s6] sm:$0x3]  ;;  %s2667_s6 = sld [smem:[#allocation7 + $0x3]] }
 0x128   :  { %891 = vrot.lane.b32.xlu1 %v882_v60, %s2939_s24  ;;  %v1462_v53 = vsel %vm1460_vm4, %v1453_v24, 0 }
 0x129   :  { %1471 = vmatpush.bf16.msrb.mxu3 %v1462_v53 }
 0x12a   :  { %1321 = vmatpush.bf16.msra.mxu1 %v2828_v27  ;;  %1372 = vmatpush.bf16.msra.mxu2 %v2836_v59  ;;  %v2854_v59 = vld [vmem:[%s3351_s12 + $0x34] sm:$0xf] }
 0x12e   :  { %1436 = vmatpush.bf16.msrb.mxu2 %v2841_v10  ;;  %v2851_v10 = vld [vmem:[%s3351_s12 + $0x14] sm:$0xf0] }
 0x14a   :  { %v621_v61 = vpop.permute.xlu0 %620 }
 0x14b   :  { %v623_v63 = vmax.f32 %v590_v26, %v621_v61  ;;  %v2820_v26 = vld [vmem:[%s3343_s4] sm:$0xff]  ;;  %s2655_s4 = sld [smem:[#allocation6 + $0x2]] }
 0x14c   :  { %1308 = vmatpush.bf16.msra.mxu0 %v2820_v26 }
 0x151   :  { %v1722_v44 = vstv %s2655_s4  ;;  %s2671_s4 = sld [smem:[#allocation6 + $0xf]] }
 0x152   :  { %v1723_v48 = vmul.f32 %v1722_v44, %v3141_v38  ;;  %v1455_v44 = vstv %s2586_s29  ;;  %s2676_s29 = sld [smem:[#allocation6 + $0x13]] }
 0x153   :  { %v626_v62 = vpop.permute.xlu0 %625 }
 0x154   :  { %v628_v0 = vmax.f32 %v616_v30, %v626_v62  ;;  %v1702_v30 = vrot.slane %v3044_v25, 2 }
 0x156   :  { %v629_v1 = vmax.f32 %v623_v63, %v628_v0  ;;  %v3137_v33 = vunpack.c.l.bf16 %v1702_v30  ;;  %v1486_v30 = vsel %vm1460_vm4, %v1479_v28, 0 }
 0x157   :  { %1495 = vmatpush.bf16.msrb.mxu0 %v1486_v30 }
 0x158   :  { %631 = vrot.lane.b32.xlu2 %v629_v1, %s2939_s24  ;;  %v1719_v43 = vmul.f32 %v1718_v37, %v3137_v33  ;;  %v2845_v37 = vld [vmem:[%s3348_s9 + $0x8] sm:$0xff] }
 0x16a   :  { %v887_v9 = vpop.permute.xlu0 %886 }
 0x16b   :  { %v889_v13 = vmax.f32 %v856_v36, %v887_v9  ;;  %v1715_v36 = vstv %s1711_s1  ;;  %s2664_s1 = sld [smem:[#allocation6 + $0x9]] }
 0x16c   :  { %v1716_v42 = vadd.f32 %v1715_v36, %v1714_v35  ;;  %v2847_v35 = vld [vmem:[%s3348_s9 + $0x18] sm:$0xff]  ;;  %v2846_v36 = vld [vmem:[%s3348_s9 + $0x10] sm:$0xff]  ;;  %s2588_s9 = sld [smem:[#allocation9 + $0x3]] }
 0x18a   :  { %v1148_v2 = vpop.permute.xlu1 %1147 }
 0x18b   :  { %v1150_v4 = vmax.f32 %v1117_v47, %v1148_v2  ;;  %v1720_v47 = vadd.f32 %v1719_v43, %v1716_v42  ;;  %v1503_v42 = vld [vmem:[%s3349_s10] sm:$0x3]  ;;  %s2683_s10 = sld [smem:[#allocation6 + $0x18]] }
 0x18c   :  { %v1508_v43 = vsel %vm1460_vm4, %v1503_v42, 0 }
 0x18d   :  { %v1724_v50 = vadd.f32 %v1723_v48, %v1720_v47  ;;  %1517 = vmatpush.bf16.msrb.mxu1 %v1508_v43 }
 0x18f   :  { %v1728_v41 = vadd.f32 %v1727_v51, %v1724_v50  ;;  %v2843_v51 = vld [vmem:[%s3350_s11] sm:$0xff]  ;;  %s2602_s11 = sld [smem:[#allocation9 + $0x5]] }
 0x191   :  { %v1729_v25 = vmax.f32 %v1728_v41, 0.0 }
 0x192   :  { %v1153_v3 = vpop.permute.xlu1 %1152 }
 0x193   :  { %v1155_v5 = vmax.f32 %v1143_v40, %v1153_v3 }
 0x195   :  { %v1156_v6 = vmax.f32 %v1150_v4, %v1155_v5  ;;  %v1582_v53 = vstv %s2602_s11  ;;  %s2686_s11 = sld [smem:[#allocation6 + $0x1b]] }
 0x197   :  { %1158 = vrot.lane.b32.xlu0 %v1156_v6, %s2939_s24  ;;  %s2669_s24 = sld [smem:[#allocation6 + $0xd]] }
 0x19a   :  { %v892_v12 = vpop.permute.xlu1 %891 }
 0x19b   :  { %v894_v14 = vmax.f32 %v882_v60, %v892_v12  ;;  %v1204_v60 = vstv %s1203_s0  ;;  %s2677_s0 = sld [smem:[#allocation7 + $0x5]] }
 0x19d   :  { %v895_v15 = vmax.f32 %v889_v13, %v894_v14  ;;  %v2842_v14 = vld [vmem:[%s3347_s8] sm:$0xff]  ;;  %s2662_s8 = sld [smem:[#allocation7 + $0x2]] }
 0x19f   :  { %896 = vst.msk [vmem:[#allocation2 + $0x2] sm:$0x3] %vm368_vm0, %v895_v15  ;;  %v1392_v15 = vstv %s2575_s5  ;;  %s2660_s5 = sld [smem:[#allocation6 + $0x6]] }
 0x1a5   :  { %v1755_v43 = vstv %s2660_s5  ;;  %s2690_s5 = sld [smem:[#allocation6 + $0x1e]] }
 0x1b2   :  { %v632_v20 = vpop.permute.xlu2 %631 }
 0x1b3   :  { %635 = vst.msk [vmem:[#allocation2] sm:$0x3] %vm634_vm1, %v632_v20 }
 0x209   :  { %v1159_v45 = vpop.permute.xlu0 %1158 }
 0x20a   :  { %1161 = vst.msk [vmem:[#allocation2 + $0x2] sm:$0x3] %vm634_vm1, %v1159_v45 }
 0x211   :  { %v1162_v40 = vld [vmem:[#allocation2] sm:$0xf] }
 0x212   :  { %1164 = vst [vmem:[#allocation1] ss:$4 sm:$0xff] %v1162_v40  ;;  %v1481_v40 = vstv %s2588_s9  ;;  %s2679_s9 = sld [smem:[#allocation6 + $0x15]] }
 0x219   :  { %v1165_v54 = vld.sshfl [vmem:[#allocation1] sm:$0xff pattern:$0x73625140]  ;;  %v1166_v55 = vld.sshfl [vmem:[#allocation1 + $0x8] sm:$0xff pattern:$0x73625140] }
 0x21a   :  { %1731 = vst [vmem:[#allocation1] ss:$4 sm:$0xff] %v1729_v25  ;;  %v1169_v56 = vpack.c.bf16 %v1165_v54, %v1165_v54  ;;  %v1170_v57 = vpack.c.bf16 %v1166_v55, %v1166_v55 }
 0x21c   :  { %1309 = vmatmul.bf16.vlgmr.msra.gmra.mxu0 %v1169_v56  ;;  %1322 = vmatmul.bf16.vlgmr.msra.gmra.mxu1 %v1170_v57 }
 0x21d   :  { %1611 = vmatpush.bf16.msra.mxu0 %v2847_v35 }
 0x221   :  { %1612 = vmatpush.bf16.msra.mxu0 %v2846_v36  ;;  %v1748_v36 = vstv %s2657_s21  ;;  %s2687_s21 = sld [smem:[#allocation7 + $0x7]] }
 0x225   :  { %1613 = vmatpush.bf16.msra.mxu0 %v2845_v37  ;;  %v1751_v37 = vstv %s2659_s22  ;;  %s2689_s22 = sld [smem:[#allocation6 + $0x1d]] }
 0x226   :  { %v1752_v42 = vmul.f32 %v1751_v37, %v3137_v33  ;;  %v1880_v37 = vstv %s2677_s0 }
 0x229   :  { %1614 = vmatpush.bf16.msra.mxu0 %v2844_v39 }
 0x299   :  { %v1310_v61 = vpop.f32.mrf.mxu0  ;;  %v1323_v62 = vpop.f32.mrf.mxu1 }
 0x29a   :  { %v1311_v63 = vadd.f32 %v1310_v61, %v1204_v60  ;;  %v2648_v60 = vld [vmem:[%s3351_s12 + $0x38] sm:$0xf0]  ;;  %v2646_v61 = vld [vmem:[%s3351_s12 + $0x30] sm:$0xf] }
 0x29c   :  { %v1324_v0 = vadd.f32 %v1323_v62, %v1311_v63  ;;  %v2651_v62 = vor.u32 %v2854_v59, %v2648_v60  ;;  %v2855_v63 = vld [vmem:[%s3351_s12 + $0x34] sm:$0xf0] }
 0x29e   :  { %v1327_v1 = vmax.f32 %v1324_v0, 0.0  ;;  %v2852_v0 = vld [vmem:[%s3351_s12 + $0x24] sm:$0xf] }
 0x2a0   :  { %v3156_v2 = vpack.c.bf16 %v1327_v1, %v1327_v1  ;;  %v2640_v1 = vld [vmem:[%s3351_s12 + $0x28] sm:$0xf0] }
 0x2a1   :  { %v1312_v3 = vpop.f32.mrf.mxu0  ;;  %v1325_v4 = vpop.f32.mrf.mxu1 }
 0x2a2   :  { %2574 = vmatmul.msk.bf16.vlgmr.msra.gmra.mxu2 %vm1361_vm2, %v3156_v2  ;;  %v2638_v3 = vld [vmem:[%s3351_s12 + $0x20] sm:$0xf]  ;;  %v2853_v4 = vld [vmem:[%s3351_s12 + $0x24] sm:$0xf0] }
 0x2a3   :  { %1540 = vmatpush.bf16.msra.mxu2 %v2842_v14 }
 0x325   :  { %v1374_v5 = vpop.f32.mrf.mxu2 }
 0x326   :  { %1379 = vrot.lane.b32.xlu1 %v1374_v5, %s2940_s17  ;;  %s2680_s17 = sld [smem:[#allocation6 + $0x16]] }
 0x32d   :  { %v1376_v6 = vpop.f32.mrf.mxu2 }
 0x32e   :  { %v2639_v6 = vor.u32 %v2853_v4, %v2638_v3  ;;  %v1814_v4 = vstv %s2667_s6 }
 0x398   :  { %v1380_v8 = vpop.permute.xlu1 %1379 }
 0x399   :  { %v1382_v9 = vmax.f32 %v1374_v5, %v1380_v8  ;;  %v2643_v5 = vor.u32 %v2852_v0, %v2640_v1  ;;  %v2632_v8 = vld [vmem:[%s3351_s12 + $0x18] sm:$0xf0]  ;;  %v1812_v1 = vstv %s2668_s23 }
 0x39a   :  { %v1813_v3 = vmul.f32 %v1812_v1, %v3131_v29  ;;  %v1920_v1 = vstv %s2685_s14 }
 0x39b   :  { %1384 = vrot.lane.b32.xlu2 %v1382_v9, %s2941_s19  ;;  %s2684_s19 = sld [smem:[#allocation6 + $0x19]] }
 0x3f5   :  { %v1385_v11 = vpop.permute.xlu2 %1384 }
 0x3f6   :  { %v1387_v12 = vmax.f32 %v1382_v9, %v1385_v11  ;;  %v2630_v9 = vld [vmem:[%s3351_s12 + $0x10] sm:$0xf]  ;;  %v2635_v11 = vor.u32 %v2850_v7, %v2632_v8  ;;  %v1815_v7 = vadd.f32 %v1814_v4, %v1813_v3  ;;  %v1921_v3 = vmul.f32 %v1920_v1, %v3141_v38 }
 0x3f7   :  { %v1924_v4 = vstv %s2686_s11 }
 0x3f8   :  { %v1388_v13 = vpack.c.bf16 %v1387_v12, %v1387_v12  ;;  %v2631_v12 = vor.u32 %v2851_v10, %v2630_v9 }
 0x3fa   :  { %2580 = vmatmul.msk.bf16.vlgmr.msra.gmra.mxu3 %vm1399_vm3, %v1388_v13  ;;  %v1526_v13 = vstv %s2591_s30  ;;  %s2678_s30 = sld [smem:[#allocation6 + $0x14]] }
 0x3fb   :  { %1567 = vmatpush.bf16.msra.mxu3 %v2843_v51 }
 0x47d   :  { %v1412_v16 = vpop.f32.mrf.mxu3 }
 0x47e   :  { %v1413_v17 = vadd.f32 %v1412_v16, %v1392_v15 }
 0x480   :  { %v1416_v18 = vmax.f32 %v1413_v17, 0.0 }
 0x482   :  { %v1417_v19 = vpack.c.bf16 %v1416_v18, %v1416_v18 }
 0x484   :  { %2585 = vmatmul.msk.bf16.vlgmr.msrb.gmra.mxu2 %vm1399_vm3, %v1417_v19 }
 0x485   :  { %v1414_v20 = vpop.f32.mrf.mxu3  ;;  %1691 = vmatpush.bf16.msrb.mxu2 %v2651_v62  ;;  %v1792_v62 = vstv %s2666_s15 }
 0x486   :  { %v2848_v20 = vld [vmem:[%s3351_s12 + $0x4] sm:$0xf]  ;;  %v1793_v0 = vmul.f32 %v1792_v62, %v3145_v46 }
 0x489   :  { %1692 = vmatpush.bf16.msrb.mxu2 %v2643_v5  ;;  %v1817_v5 = vstv %s2669_s24 }
 0x48a   :  { %v1818_v8 = vmul.f32 %v1817_v5, %v3137_v33 }
 0x48d   :  { %1693 = vmatpush.bf16.msrb.mxu2 %v2635_v11  ;;  %v1821_v11 = vstv %s2670_s25 }
 0x494   :  { %2596 = vmatmul.msk.bf16.vlgmr.msra.gmra.mxu2 %vm1399_vm3, %v1417_v19 }
 0x507   :  { %v1438_v21 = vpop.f32.mrf.mxu2 }
 0x508   :  { %1443 = vrot.lane.b32.xlu0 %v1438_v21, %s2942_s3  ;;  %s2663_s3 = sld [smem:[#allocation6 + $0x8]] }
 0x50f   :  { %v1440_v22 = vpop.f32.mrf.mxu2 }
 0x510   :  { %v2622_v22 = vld [vmem:[%s3351_s12] sm:$0xf] }
 0x517   :  { %v3172_v23 = vpop.f32.mrf.mxu2 }
 0x518   :  { %v1543_v14 = vadd.f32 %v3172_v23, %v1526_v13  ;;  %v1822_v13 = vmul.f32 %v1821_v11, %v3141_v38 }
 0x51a   :  { %v1546_v15 = vmax.f32 %v1543_v14, 0.0  ;;  %v1825_v14 = vstv %s2671_s4 }
 0x51f   :  { %v1544_v52 = vpop.f32.mrf.mxu2 }
 0x520   :  { %v2849_v52 = vld [vmem:[%s3351_s12 + $0x4] sm:$0xf0] }
 0x521   :  { %v2623_v24 = vor.u32 %v2849_v52, %v2622_v22 }
 0x57a   :  { %v1444_v26 = vpop.permute.xlu0 %1443 }
 0x57b   :  { %v1446_v27 = vmax.f32 %v1438_v21, %v1444_v26  ;;  %v2624_v21 = vld [vmem:[%s3351_s12 + $0x8] sm:$0xf0]  ;;  %s2661_s12 = sld [smem:[#allocation6 + $0x7]] }
 0x57c   :  { %v2627_v23 = vor.u32 %v2848_v20, %v2624_v21  ;;  %v1847_v20 = vstv %s2672_s26  ;;  %v1850_v21 = vstv %s2674_s27 }
 0x57d   :  { %1448 = vrot.lane.b32.xlu1 %v1446_v27, %s2943_s13  ;;  %s2665_s13 = sld [smem:[#allocation6 + $0xa]]  ;;  %v1851_v52 = vmul.f32 %v1850_v21, %v3137_v33 }
 0x57e   :  { %1694 = vmatpush.bf16.msrb.mxu2 %v2627_v23 }
 0x583   :  { %v1788_v59 = vstv %s2665_s13 }
 0x5ef   :  { %v1449_v31 = vpop.permute.xlu1 %1448 }
 0x5f0   :  { %v1451_v32 = vmax.f32 %v1446_v27, %v1449_v31 }
 0x5f2   :  { %v1452_v34 = vpack.c.bf16 %v1451_v32, %v1451_v32 }
 0x5f4   :  { %2587 = vmatmul.msk.bf16.vlgmr.msrb.gmra.mxu3 %vm1456_vm5, %v1452_v34  ;;  %v1746_v34 = vstv %s2658_s20  ;;  %s2688_s20 = sld [smem:[#allocation6 + $0x1c]] }
 0x5f5   :  { %v1747_v35 = vmul.f32 %v1746_v34, %v3131_v29  ;;  %v1878_v34 = vstv %s2678_s30 }
 0x5f7   :  { %v1749_v39 = vadd.f32 %v1748_v36, %v1747_v35  ;;  %v1879_v36 = vmul.f32 %v1878_v34, %v3131_v29 }
 0x677   :  { %v1473_v45 = vpop.f32.mrf.mxu3 }
 0x678   :  { %v1474_v47 = vadd.f32 %v1473_v45, %v1455_v44  ;;  %v1753_v44 = vadd.f32 %v1752_v42, %v1749_v39  ;;  %v1756_v45 = vmul.f32 %v1755_v43, %v3141_v38  ;;  %v1883_v39 = vstv %s2679_s9 }
 0x679   :  { %v1881_v43 = vadd.f32 %v1880_v37, %v1879_v36 }
 0x67a   :  { %v1477_v48 = vmax.f32 %v1474_v47, 0.0  ;;  %v1759_v47 = vstv %s2661_s12  ;;  %s2691_s12 = sld [smem:[#allocation6 + $0x1f]] }
 0x67c   :  { %v1478_v49 = vpack.c.bf16 %v1477_v48, %v1477_v48  ;;  %v1757_v48 = vadd.f32 %v1756_v45, %v1753_v44  ;;  %v1884_v44 = vmul.f32 %v1883_v39, %v3137_v33 }
 0x67e   :  { %2589 = vmatmul.msk.bf16.vlgmr.msrb.gmra.mxu0 %vm1456_vm5, %v1478_v49  ;;  %v1760_v49 = vmul.f32 %v1759_v47, %v3145_v46 }
 0x67f   :  { %v1475_v50 = vpop.f32.mrf.mxu3 }
 0x680   :  { %v1779_v50 = vstv %s2663_s3  ;;  %v1761_v51 = vadd.f32 %v1760_v49, %v1757_v48  ;;  %v1887_v48 = vstv %s2680_s17  ;;  %v1885_v49 = vadd.f32 %v1884_v44, %v1881_v43 }
 0x68e   :  { %2619 = vmatmul.msk.bf16.vlgmr.msra.gmra.mxu0 %vm1361_vm2, %v3156_v2  ;;  %v2647_v2 = vor.u32 %v2855_v63, %v2646_v61  ;;  %v1789_v61 = vmul.f32 %v1788_v59, %v3141_v38  ;;  %v1916_v59 = vstv %s2684_s19 }
 0x68f   :  { %v1917_v62 = vmul.f32 %v1916_v59, %v3137_v33 }
 0x690   :  { %1678 = vmatpush.bf16.msra.mxu1 %v2647_v2 }
 0x694   :  { %1679 = vmatpush.bf16.msra.mxu1 %v2639_v6 }
 0x698   :  { %1680 = vmatpush.bf16.msra.mxu1 %v2631_v12  ;;  %v1819_v12 = vadd.f32 %v1818_v8, %v1815_v7  ;;  %v1944_v7 = vstv %s2688_s20 }
 0x699   :  { %v1945_v11 = vmul.f32 %v1944_v7, %v3131_v29 }
 0x69c   :  { %1681 = vmatpush.bf16.msra.mxu1 %v2623_v24 }
 0x6fb   :  { %v1497_v41 = vpop.f32.mrf.mxu0 }
 0x6fc   :  { %v1498_v25 = vadd.f32 %v1497_v41, %v1481_v40  ;;  %v1780_v40 = vmul.f32 %v1779_v50, %v3131_v29  ;;  %v1781_v41 = vstv %s2662_s8  ;;  %v1888_v50 = vmul.f32 %v1887_v48, %v3141_v38 }
 0x6fe   :  { %v1501_v54 = vmax.f32 %v1498_v25, 0.0  ;;  %v1784_v25 = vstv %s2664_s1 }
 0x700   :  { %v1502_v55 = vpack.c.bf16 %v1501_v54, %v1501_v54  ;;  %v1762_v54 = vmax.f32 %v1761_v51, 0.0  ;;  %v1891_v51 = vstv %s2681_s2 }
 0x702   :  { %2590 = vmatmul.msk.bf16.vlgmr.msrb.gmra.mxu1 %vm1456_vm5, %v1502_v55  ;;  %v1782_v55 = vadd.f32 %v1781_v41, %v1780_v40  ;;  %v1889_v40 = vadd.f32 %v1888_v50, %v1885_v49  ;;  %v1892_v41 = vmul.f32 %v1891_v51, %v3145_v46 }
 0x703   :  { %v1499_v56 = vpop.f32.mrf.mxu0 }
 0x704   :  { %v1785_v56 = vmul.f32 %v1784_v25, %v3137_v33  ;;  %v1911_v25 = vstv %s2683_s10 }
 0x706   :  { %v1786_v60 = vadd.f32 %v1785_v56, %v1782_v55  ;;  %v1912_v55 = vmul.f32 %v1911_v25, %v3131_v29  ;;  %v1913_v56 = vstv %s2682_s18 }
 0x708   :  { %v1790_v63 = vadd.f32 %v1789_v61, %v1786_v60  ;;  %v1914_v61 = vadd.f32 %v1913_v56, %v1912_v55 }
 0x70a   :  { %v1794_v2 = vadd.f32 %v1793_v0, %v1790_v63 }
 0x70b   :  { %v1616_v57 = vpop.f32.mrf.mxu0 }
 0x70c   :  { %v1617_v26 = vadd.f32 %v1616_v57, %v1582_v53  ;;  %v3264_v57 = vld.sshfl [vmem:[#allocation1] sm:$0xff pattern:$0x73625140]  ;;  %v1795_v6 = vmax.f32 %v1794_v2, 0.0  ;;  %v1918_v2 = vadd.f32 %v1917_v62, %v1914_v61 }
 0x70e   :  { %v1620_v27 = vmax.f32 %v1617_v26, 0.0  ;;  %v1854_v26 = vstv %s2675_s28  ;;  %v1922_v5 = vadd.f32 %v1921_v3, %v1918_v2 }
 0x713   :  { %v1618_v58 = vpop.f32.mrf.mxu0 }
 0x714   :  { %v3266_v58 = vld.sshfl [vmem:[#allocation1 + $0x8] sm:$0xff pattern:$0x73625140] }
 0x715   :  { %1764 = vst [vmem:[#allocation1] ss:$4 sm:$0xff] %v1762_v54  ;;  %v1893_v54 = vadd.f32 %v1892_v41, %v1889_v40 }
 0x717   :  { %v1894_v60 = vmax.f32 %v1893_v54, 0.0 }
 0x71c   :  { %v3272_v9 = vld.sshfl [vmem:[#allocation1] sm:$0xff pattern:$0x73625140]  ;;  %v3274_v10 = vld.sshfl [vmem:[#allocation1 + $0x8] sm:$0xff pattern:$0x73625140] }
 0x71d   :  { %1797 = vst [vmem:[#allocation1] ss:$4 sm:$0xff] %v1795_v6  ;;  %v1925_v6 = vmul.f32 %v1924_v4, %v3145_v46 }
 0x71f   :  { %v1926_v8 = vadd.f32 %v1925_v6, %v1922_v5 }
 0x724   :  { %v3280_v24 = vld.sshfl [vmem:[#allocation1] sm:$0xff pattern:$0x73625140]  ;;  %v3282_v53 = vld.sshfl [vmem:[#allocation1 + $0x8] sm:$0xff pattern:$0x73625140] }
 0x77f   :  { %v1519_v16 = vpop.f32.mrf.mxu1 }
 0x780   :  { %v1547_v17 = vadd.f32 %v1546_v15, %v1519_v16  ;;  %v1823_v15 = vadd.f32 %v1822_v13, %v1819_v12  ;;  %v1826_v16 = vmul.f32 %v1825_v14, %v3145_v46  ;;  %v1946_v12 = vstv %s2687_s21 }
 0x781   :  { %v1949_v13 = vstv %s2689_s22  ;;  %v1927_v14 = vmax.f32 %v1926_v8, 0.0 }
 0x782   :  { %v1548_v18 = vpack.c.bf16 %v1547_v17, %v1547_v17  ;;  %v1845_v17 = vstv %s2673_s7 }
 0x784   :  { %2601 = vmatmul.msk.bf16.vlgmr.msra.gmra.mxu3 %vm1399_vm3, %v1548_v18  ;;  %v1827_v18 = vadd.f32 %v1826_v16, %v1823_v15  ;;  %v1947_v15 = vadd.f32 %v1946_v12, %v1945_v11  ;;  %v1950_v16 = vmul.f32 %v1949_v13, %v3137_v33 }
 0x786   :  { %v1828_v22 = vmax.f32 %v1827_v18, 0.0 }
 0x787   :  { %v1521_v19 = vpop.f32.mrf.mxu1 }
 0x788   :  { %v1846_v19 = vmul.f32 %v1845_v17, %v3131_v29  ;;  %1830 = vst [vmem:[#allocation1] ss:$4 sm:$0xff] %v1828_v22  ;;  %v1957_v22 = vstv %s2691_s12 }
 0x78a   :  { %v1848_v23 = vadd.f32 %v1847_v20, %v1846_v19  ;;  %v1953_v19 = vstv %s2690_s5  ;;  %v1951_v20 = vadd.f32 %v1950_v16, %v1947_v15 }
 0x78b   :  { %v1954_v21 = vmul.f32 %v1953_v19, %v3141_v38 }
 0x78f   :  { %v3288_v45 = vld.sshfl [vmem:[#allocation1] sm:$0xff pattern:$0x73625140]  ;;  %v1832_v47 = vld.sshfl [vmem:[#allocation1 + $0x8] sm:$0xff pattern:$0x73625140] }
 0x807   :  { %v1569_v28 = vpop.f32.mrf.mxu3 }
 0x808   :  { %v1621_v30 = vadd.f32 %v1620_v27, %v1569_v28  ;;  %v1852_v27 = vadd.f32 %v1851_v52, %v1848_v23  ;;  %v1855_v28 = vmul.f32 %v1854_v26, %v3141_v38  ;;  %v1955_v23 = vadd.f32 %v1954_v21, %v1951_v20 }
 0x809   :  { %v1958_v52 = vmul.f32 %v1957_v22, %v3145_v46 }
 0x80a   :  { %v1622_v31 = vpack.c.bf16 %v1621_v30, %v1621_v30  ;;  %v1858_v30 = vstv %s2676_s29 }
 0x80b   :  { %v1959_v26 = vadd.f32 %v1958_v52, %v1955_v23 }
 0x80c   :  { %2652 = vmatmul.msk.bf16.vlgmr.msra.gmra.mxu1 %vm1361_vm2, %v1622_v31  ;;  %2653 = vmatmul.msk.bf16.vlgmr.msrb.gmra.mxu2 %vm1361_vm2, %v1622_v31  ;;  %v1856_v31 = vadd.f32 %v1855_v28, %v1852_v27 }
 0x80d   :  { %v1960_v27 = vmax.f32 %v1959_v26, 0.0 }
 0x80f   :  { %v1571_v32 = vpop.f32.mrf.mxu3 }
 0x810   :  { %v1859_v32 = vmul.f32 %v1858_v30, %v3145_v46 }
 0x812   :  { %v1860_v35 = vadd.f32 %v1859_v32, %v1856_v31 }
 0x814   :  { %v1861_v42 = vmax.f32 %v1860_v35, 0.0 }
 0x816   :  { %1863 = vst [vmem:[#allocation1] ss:$4 sm:$0xff] %v1861_v42 }
 0x81d   :  { %v1864_v63 = vld.sshfl [vmem:[#allocation1] sm:$0xff pattern:$0x73625140]  ;;  %v1865_v0 = vld.sshfl [vmem:[#allocation1 + $0x8] sm:$0xff pattern:$0x73625140] }
 0x81e   :  { %1896 = vst [vmem:[#allocation1] ss:$4 sm:$0xff] %v1894_v60 }
 0x825   :  { %v1897_v17 = vld.sshfl [vmem:[#allocation1] sm:$0xff pattern:$0x73625140]  ;;  %v1898_v18 = vld.sshfl [vmem:[#allocation1 + $0x8] sm:$0xff pattern:$0x73625140] }
 0x826   :  { %1929 = vst [vmem:[#allocation1] ss:$4 sm:$0xff] %v1927_v14 }
 0x82d   :  { %v1930_v29 = vld.sshfl [vmem:[#allocation1] sm:$0xff pattern:$0x73625140]  ;;  %v1931_v28 = vld.sshfl [vmem:[#allocation1 + $0x8] sm:$0xff pattern:$0x73625140] }
 0x82e   :  { %1962 = vst [vmem:[#allocation1] ss:$4 sm:$0xff] %v1960_v27 }
 0x835   :  { %v1964_v31 = vld.sshfl [vmem:[#allocation1 + $0x8] sm:$0xff pattern:$0x73625140] }
 0x889   :  { %v1683_v30 = vpop.f32.mrf.mxu1 }
 0x88a   :  { %v1736_v33 = vmul.f32 %v3264_v57, %v1683_v30  ;;  %v1769_v32 = vmul.f32 %v3272_v9, %v1683_v30  ;;  %v1802_v34 = vmul.f32 %v3280_v24, %v1683_v30  ;;  %v1835_v9 = vmul.f32 %v3288_v45, %v1683_v30 }
 0x88b   :  { %v1868_v24 = vmul.f32 %v1864_v63, %v1683_v30  ;;  %v1901_v54 = vmul.f32 %v1897_v17, %v1683_v30  ;;  %v1934_v59 = vmul.f32 %v1930_v29, %v1683_v30 }
 0x88f   :  { %v1696_v35 = vpop.f32.mrf.mxu2 }
 0x890   :  { %v1737_v38 = vmul.f32 %v3266_v58, %v1696_v35  ;;  %v1770_v36 = vmul.f32 %v3274_v10, %v1696_v35  ;;  %v1803_v46 = vmul.f32 %v3282_v53, %v1696_v35  ;;  %v1836_v37 = vmul.f32 %v1832_v47, %v1696_v35  ;;  %v1963_v58 = vld.sshfl [vmem:[#allocation1] sm:$0xff pattern:$0x73625140] }
 0x891   :  { %v1869_v39 = vmul.f32 %v1865_v0, %v1696_v35  ;;  %v1902_v42 = vmul.f32 %v1898_v18, %v1696_v35  ;;  %v1935_v43 = vmul.f32 %v1931_v28, %v1696_v35  ;;  %v1968_v44 = vmul.f32 %v1964_v31, %v1696_v35  ;;  %v1685_v48 = vpop.f32.mrf.mxu1 }
 0x892   :  { %v1740_v49 = vrot.slane %v1737_v38, 6  ;;  %v1773_v50 = vrot.slane %v1770_v36, 6  ;;  %v1806_v57 = vrot.slane %v1803_v46, 6  ;;  %v1839_v51 = vrot.slane %v1836_v37, 6 }
 0x893   :  { %v1872_v40 = vrot.slane %v1869_v39, 6  ;;  %v1905_v41 = vrot.slane %v1902_v42, 6  ;;  %v1938_v25 = vrot.slane %v1935_v43, 6  ;;  %v1971_v56 = vrot.slane %v1968_v44, 6 }
 0x894   :  { %v1741_v10 = vsel %vm1460_vm4, %v1736_v33, %v1740_v49  ;;  %v1774_v53 = vsel %vm1460_vm4, %v1769_v32, %v1773_v50  ;;  %v1807_v47 = vsel %vm1460_vm4, %v1802_v34, %v1806_v57  ;;  %v1840_v55 = vsel %vm1460_vm4, %v1835_v9, %v1839_v51 }
 0x895   :  { %1743 = vst [vmem:[%s3355_s16] sm:$0xf] %v1741_v10  ;;  %v1873_v45 = vsel %vm1460_vm4, %v1868_v24, %v1872_v40  ;;  %v1967_v60 = vmul.f32 %v1963_v58, %v1683_v30  ;;  %v1906_v61 = vsel %vm1460_vm4, %v1901_v54, %v1905_v41  ;;  %v1939_v63 = vsel %vm1460_vm4, %v1934_v59, %v1938_v25 }
 0x896   :  { %1776 = vst [vmem:[%s3355_s16 + $0x4] sm:$0xf] %v1774_v53 }
 0x897   :  { %1809 = vst [vmem:[%s3355_s16 + $0x8] sm:$0xf] %v1807_v47  ;;  %v1698_v62 = vpop.f32.mrf.mxu2  ;;  %v1972_v0 = vsel %vm1460_vm4, %v1967_v60, %v1971_v56 }
 0x898   :  { %1842 = vst [vmem:[%s3355_s16 + $0xc] sm:$0xf] %v1840_v55 }
 0x899   :  { %1875 = vst [vmem:[%s3355_s16 + $0x10] sm:$0xf] %v1873_v45 }
 0x89a   :  { %1908 = vst [vmem:[%s3355_s16 + $0x14] sm:$0xf] %v1906_v61 }
 0x89b   :  { %1941 = vst [vmem:[%s3355_s16 + $0x18] sm:$0xf] %v1939_v63 }
 0x89c   :  { %1974 = vst [vmem:[%s3355_s16 + $0x1c] sm:$0xf] %v1972_v0 }
 0x89d   :  { %1979 = vsyncpa [#allocation4], 1 }
 0x89e   :  { %1980 = vsyncpa [#allocation5], 1 }
 0x89f   :  { %1981 = vsyncpa [#allocation8], 1 }

</bundles_post_ra>
